<compile_context>
chip_gen: v7x
topology: tpu7x:2x2x1
jax: 0.10.0
libtpu: 0.0.40
codegen_flags: <defaults>
</compile_context>

<pallas_src>
import jax
import jax.numpy as jnp
from jax.experimental import pallas as pl
from jax.experimental.pallas import tpu as pltpu


# ----------------------------------------------------------------------------
# Fused self-attention kernel (one batch element per grid step)
# ----------------------------------------------------------------------------
def _self_attn_kernel(x_ref, wq_ref, wk_ref, wv_ref, bq_ref, bk_ref, bv_ref,
                      gamma_ref, out_ref):
    xt = x_ref[0]                                                   # (C, N)

    # 1x1-conv projections as (Cout, Cin) x (Cin, N) MXU matmuls + fused bias.
    qt = jnp.dot(wq_ref[...], xt, preferred_element_type=jnp.float32) + bq_ref[...]  # (Cq, N)
    kt = jnp.dot(wk_ref[...], xt, preferred_element_type=jnp.float32) + bk_ref[...]  # (Cq, N)
    vt = jnp.dot(wv_ref[...], xt, preferred_element_type=jnp.float32) + bv_ref[...]  # (C,  N)

    # energy[i, j] = <q_i, k_j>  (contract the channel dim of both operands).
    energy = jax.lax.dot_general(qt, kt, (((0,), (0,)), ((), ())),
                                 preferred_element_type=jnp.float32)  # (N, N)

    # Numerically stable softmax over the last axis (matches nn.Softmax(dim=-1)).
    m = jnp.max(energy, axis=-1, keepdims=True)
    p = jnp.exp(energy - m)
    denom = jnp.sum(p, axis=-1, keepdims=True)
    attn = p * pl.reciprocal(denom, approx=False)                     # (N, N)

    # out[c, i] = sum_j v[c, j] * attn[i, j]   (== bmm(V, attention^T))
    out_t = jax.lax.dot_general(vt, attn, (((1,), (1,)), ((), ())),
                                preferred_element_type=jnp.float32)   # (C, N)

    out_ref[0] = (gamma_ref[0] * out_t + xt).astype(out_ref.dtype)


# ----------------------------------------------------------------------------
# Wrapper
# ----------------------------------------------------------------------------
def self_attn_forward(x_nchw, params):
    """x_nchw: (B, C, W, H) fp32.  Returns (B, C, W, H)."""
    B, C, W, H = x_nchw.shape
    N = W * H
    Cq = C // 8

    x_flat = x_nchw.reshape(B, C, N)          # contiguous reshape, no data movement

    out_flat = pl.pallas_call(
        _self_attn_kernel,
        out_shape=jax.ShapeDtypeStruct((B, C, N), x_nchw.dtype),
        grid=(B,),
        in_specs=[
            pl.BlockSpec((1, C, N), lambda b: (b, 0, 0)),        # x (one batch element)
            pl.BlockSpec((Cq, C), lambda b: (0, 0)),             # Wq (Cout, Cin)
            pl.BlockSpec((Cq, C), lambda b: (0, 0)),             # Wk
            pl.BlockSpec((C, C), lambda b: (0, 0)),              # Wv
            pl.BlockSpec((Cq, 1), lambda b: (0, 0)),             # bq
            pl.BlockSpec((Cq, 1), lambda b: (0, 0)),             # bk
            pl.BlockSpec((C, 1), lambda b: (0, 0)),              # bv
            pl.BlockSpec(memory_space=pltpu.MemorySpace.SMEM),   # gamma (scalar)
        ],
        out_specs=pl.BlockSpec((1, C, N), lambda b: (b, 0, 0)),
        compiler_params=pltpu.CompilerParams(
            dimension_semantics=("parallel",)),
    )(x_flat,
      params["wq"], params["wk"], params["wv"],
      params["bq"].reshape(Cq, 1), params["bk"].reshape(Cq, 1),
      params["bv"].reshape(C, 1),
      params["gamma"])

    return out_flat.reshape(B, C, W, H)


# ----------------------------------------------------------------------------
# Pure-JAX reference mirroring the PyTorch forward (for a correctness check)
# ----------------------------------------------------------------------------
def self_attn_reference(x, params):
    B, C, W, H = x.shape
    N = W * H
    hp = jax.lax.Precision.HIGHEST
    xf = x.reshape(B, C, N)
    pq = jnp.einsum("dc,bcn->bdn", params["wq"], xf, precision=hp) + params["bq"][None, :, None]
    pk = jnp.einsum("dc,bcn->bdn", params["wk"], xf, precision=hp) + params["bk"][None, :, None]
    pv = jnp.einsum("dc,bcn->bdn", params["wv"], xf, precision=hp) + params["bv"][None, :, None]
    energy = jnp.einsum("bdi,bdj->bij", pq, pk, precision=hp)            # (B, N, N)
    attn = jax.nn.softmax(energy, axis=-1)
    out = jnp.einsum("bcj,bij->bci", pv, attn, precision=hp)             # (B, C, N)
    return params["gamma"][0] * out.reshape(B, C, W, H) + x


# ----------------------------------------------------------------------------
# Main
# ----------------------------------------------------------------------------
if __name__ == "__main__":
    key = jax.random.PRNGKey(0)
    kx, kq, kk, kv, kbq, kbk, kbv = jax.random.split(key, 7)

    # in_dim must be divisible by 8 (query/key channels = in_dim // 8).
    B, C, W, H = 2, 32, 16, 16
    Cq = C // 8

    x = jax.random.normal(kx, (B, C, W, H), jnp.float32)

    params = {
        "wq": jax.random.normal(kq, (Cq, C), jnp.float32) / jnp.sqrt(C),
        "wk": jax.random.normal(kk, (Cq, C), jnp.float32) / jnp.sqrt(C),
        "wv": jax.random.normal(kv, (C, C), jnp.float32) / jnp.sqrt(C),
        "bq": jax.random.normal(kbq, (Cq,), jnp.float32) * 0.01,
        "bk": jax.random.normal(kbk, (Cq,), jnp.float32) * 0.01,
        "bv": jax.random.normal(kbv, (C,), jnp.float32) * 0.01,
        # PyTorch initializes gamma to 0 (which would make out == x exactly);
        # use a nonzero value so the attention path is actually exercised.
        "gamma": jnp.array([0.5], jnp.float32),
    }

    fwd = jax.jit(self_attn_forward)
    out = fwd(x, params)
    jax.block_until_ready(out)

    ref = self_attn_reference(x, params)
    assert out.shape == (B, C, W, H)
    assert jnp.allclose(out, ref, atol=1e-3, rtol=1e-3), float(jnp.max(jnp.abs(out - ref)))
    print("KERNEL_OK")
</pallas_src>

<mosaic_0001>
module attributes {stable_mosaic.version = 11 : i64} {
  func.func @_self_attn_kernel(%arg0: i32, %arg1: memref<1x32x256xf32, #tpu.memory_space<vmem>>, %arg2: memref<4x32xf32, #tpu.memory_space<vmem>>, %arg3: memref<4x32xf32, #tpu.memory_space<vmem>>, %arg4: memref<32x32xf32, #tpu.memory_space<vmem>>, %arg5: memref<4x1xf32, #tpu.memory_space<vmem>>, %arg6: memref<4x1xf32, #tpu.memory_space<vmem>>, %arg7: memref<32x1xf32, #tpu.memory_space<vmem>>, %arg8: memref<1xf32, #tpu.memory_space<smem>>, %arg9: memref<1x32x256xf32, #tpu.memory_space<vmem>>) attributes {dimension_semantics = [#tpu.dimension_semantics<parallel>], iteration_bounds = array<i64: 2>, scalar_prefetch = 0 : i64, scratch_operands = 0 : i64, tpu.core_type = #tpu.core_type<tc>, window_params = [{transform_indices = @transform_0, window_bounds = array<i64: 1, 32, 256>}, {pipeline_mode = #tpu.pipeline_mode<synchronous>, transform_indices = @transform_1, window_bounds = array<i64: 4, 32>}, {pipeline_mode = #tpu.pipeline_mode<synchronous>, transform_indices = @transform_2, window_bounds = array<i64: 4, 32>}, {pipeline_mode = #tpu.pipeline_mode<synchronous>, transform_indices = @transform_3, window_bounds = array<i64: 32, 32>}, {pipeline_mode = #tpu.pipeline_mode<synchronous>, transform_indices = @transform_4, window_bounds = array<i64: 4, 1>}, {pipeline_mode = #tpu.pipeline_mode<synchronous>, transform_indices = @transform_5, window_bounds = array<i64: 4, 1>}, {pipeline_mode = #tpu.pipeline_mode<synchronous>, transform_indices = @transform_6, window_bounds = array<i64: 32, 1>}, {transform_indices = @transform_7, window_bounds = array<i64: 1>}, {transform_indices = @transform_8, window_bounds = array<i64: 1, 32, 256>}]} {
    %c0 = arith.constant 0 : index
    %c0_0 = arith.constant 0 : index
    %c0_1 = arith.constant 0 : index
    %0 = vector.load %arg1[%c0, %c0_0, %c0_1] : memref<1x32x256xf32, #tpu.memory_space<vmem>>, vector<1x32x256xf32>
    %1 = vector.shape_cast %0 : vector<1x32x256xf32> to vector<32x256xf32>
    %c0_2 = arith.constant 0 : index
    %c0_3 = arith.constant 0 : index
    %2 = vector.load %arg2[%c0_2, %c0_3] : memref<4x32xf32, #tpu.memory_space<vmem>>, vector<4x32xf32>
    %cst = arith.constant dense<0.000000e+00> : vector<4x256xf32>
    %3 = tpu.matmul %2, %1, %cst {dimension_numbers = #tpu.dot_dimension_numbers<[1], [0], [0], [1], [0, 0, 1, 1], [], []>} : vector<4x32xf32>, vector<32x256xf32>, vector<4x256xf32> -> vector<4x256xf32>
    %c0_4 = arith.constant 0 : index
    %c0_5 = arith.constant 0 : index
    %4 = vector.load %arg5[%c0_4, %c0_5] : memref<4x1xf32, #tpu.memory_space<vmem>>, vector<4x1xf32>
    %5 = vector.broadcast %4 : vector<4x1xf32> to vector<4x256xf32>
    %6 = arith.addf %3, %5 : vector<4x256xf32>
    %c0_6 = arith.constant 0 : index
    %c0_7 = arith.constant 0 : index
    %7 = vector.load %arg3[%c0_6, %c0_7] : memref<4x32xf32, #tpu.memory_space<vmem>>, vector<4x32xf32>
    %cst_8 = arith.constant dense<0.000000e+00> : vector<4x256xf32>
    %8 = tpu.matmul %7, %1, %cst_8 {dimension_numbers = #tpu.dot_dimension_numbers<[1], [0], [0], [1], [0, 0, 1, 1], [], []>} : vector<4x32xf32>, vector<32x256xf32>, vector<4x256xf32> -> vector<4x256xf32>
    %c0_9 = arith.constant 0 : index
    %c0_10 = arith.constant 0 : index
    %9 = vector.load %arg6[%c0_9, %c0_10] : memref<4x1xf32, #tpu.memory_space<vmem>>, vector<4x1xf32>
    %10 = vector.broadcast %9 : vector<4x1xf32> to vector<4x256xf32>
    %11 = arith.addf %8, %10 : vector<4x256xf32>
    %c0_11 = arith.constant 0 : index
    %c0_12 = arith.constant 0 : index
    %12 = vector.load %arg4[%c0_11, %c0_12] : memref<32x32xf32, #tpu.memory_space<vmem>>, vector<32x32xf32>
    %cst_13 = arith.constant dense<0.000000e+00> : vector<32x256xf32>
    %13 = tpu.matmul %12, %1, %cst_13 {dimension_numbers = #tpu.dot_dimension_numbers<[1], [0], [0], [1], [0, 0, 1, 1], [], []>} : vector<32x32xf32>, vector<32x256xf32>, vector<32x256xf32> -> vector<32x256xf32>
    %c0_14 = arith.constant 0 : index
    %c0_15 = arith.constant 0 : index
    %14 = vector.load %arg7[%c0_14, %c0_15] : memref<32x1xf32, #tpu.memory_space<vmem>>, vector<32x1xf32>
    %15 = vector.broadcast %14 : vector<32x1xf32> to vector<32x256xf32>
    %16 = arith.addf %13, %15 : vector<32x256xf32>
    %cst_16 = arith.constant dense<0.000000e+00> : vector<256x256xf32>
    %17 = tpu.matmul %6, %11, %cst_16 {dimension_numbers = #tpu.dot_dimension_numbers<[0], [0], [1], [1], [0, 1, 1, 1], [], []>} : vector<4x256xf32>, vector<4x256xf32>, vector<256x256xf32> -> vector<256x256xf32>
    %cst_17 = arith.constant dense<0xFF800000> : vector<256xf32>
    %18 = vector.multi_reduction <maximumf>, %17, %cst_17 [1] : vector<256x256xf32> to vector<256xf32>
    %19 = vector.shape_cast %18 : vector<256xf32> to vector<256x1xf32>
    %20 = vector.broadcast %19 : vector<256x1xf32> to vector<256x256xf32>
    %21 = arith.subf %17, %20 : vector<256x256xf32>
    %22 = math.exp %21 : vector<256x256xf32>
    %cst_18 = arith.constant dense<0.000000e+00> : vector<256xf32>
    %23 = vector.multi_reduction <add>, %22, %cst_18 [1] : vector<256x256xf32> to vector<256xf32>
    %24 = vector.shape_cast %23 : vector<256xf32> to vector<256x1xf32>
    %25 = tpu.reciprocal %24 : vector<256x1xf32> -> vector<256x1xf32>
    %26 = vector.broadcast %25 : vector<256x1xf32> to vector<256x256xf32>
    %27 = arith.mulf %22, %26 : vector<256x256xf32>
    %cst_19 = arith.constant dense<0.000000e+00> : vector<32x256xf32>
    %28 = tpu.matmul %16, %27, %cst_19 {dimension_numbers = #tpu.dot_dimension_numbers<[1], [1], [0], [0], [0, 0, 1, 0], [], []>} : vector<32x256xf32>, vector<256x256xf32>, vector<32x256xf32> -> vector<32x256xf32>
    %c0_20 = arith.constant 0 : index
    %29 = memref.load %arg8[%c0_20] : memref<1xf32, #tpu.memory_space<smem>>
    %30 = vector.broadcast %29 : f32 to vector<32x256xf32>
    %31 = arith.mulf %30, %28 : vector<32x256xf32>
    %32 = arith.addf %31, %1 : vector<32x256xf32>
    %c0_21 = arith.constant 0 : index
    %c0_22 = arith.constant 0 : index
    %c0_23 = arith.constant 0 : index
    %33 = vector.load %arg9[%c0_21, %c0_22, %c0_23] : memref<1x32x256xf32, #tpu.memory_space<vmem>>, vector<1x32x256xf32>
    %34 = vector.shape_cast %33 : vector<1x32x256xf32> to vector<32x256xf32>
    %35 = vector.shape_cast %32 : vector<32x256xf32> to vector<1x32x256xf32>
    tpu.vector_store %arg9[%c0_21, %c0_22, %c0_23], %35 {strides = array<i32>} : memref<1x32x256xf32, #tpu.memory_space<vmem>>, vector<1x32x256xf32>,
    return
  }
  func.func @transform_0(%arg0: i32) -> (i32, i32, i32) {
    %c0_i32 = arith.constant 0 : i32
    %c0_i32_0 = arith.constant 0 : i32
    %c0_i32_1 = arith.constant 0 : i32
    return %arg0, %c0_i32, %c0_i32_0 : i32, i32, i32
  }
  func.func @transform_1(%arg0: i32) -> (i32, i32) {
    %c0_i32 = arith.constant 0 : i32
    %c0_i32_0 = arith.constant 0 : i32
    %c0_i32_1 = arith.constant 0 : i32
    return %c0_i32, %c0_i32_0 : i32, i32
  }
  func.func @transform_2(%arg0: i32) -> (i32, i32) {
    %c0_i32 = arith.constant 0 : i32
    %c0_i32_0 = arith.constant 0 : i32
    %c0_i32_1 = arith.constant 0 : i32
    return %c0_i32, %c0_i32_0 : i32, i32
  }
  func.func @transform_3(%arg0: i32) -> (i32, i32) {
    %c0_i32 = arith.constant 0 : i32
    %c0_i32_0 = arith.constant 0 : i32
    %c0_i32_1 = arith.constant 0 : i32
    return %c0_i32, %c0_i32_0 : i32, i32
  }
  func.func @transform_4(%arg0: i32) -> (i32, i32) {
    %c0_i32 = arith.constant 0 : i32
    %c0_i32_0 = arith.constant 0 : i32
    %c0_i32_1 = arith.constant 0 : i32
    return %c0_i32, %c0_i32_0 : i32, i32
  }
  func.func @transform_5(%arg0: i32) -> (i32, i32) {
    %c0_i32 = arith.constant 0 : i32
    %c0_i32_0 = arith.constant 0 : i32
    %c0_i32_1 = arith.constant 0 : i32
    return %c0_i32, %c0_i32_0 : i32, i32
  }
  func.func @transform_6(%arg0: i32) -> (i32, i32) {
    %c0_i32 = arith.constant 0 : i32
    %c0_i32_0 = arith.constant 0 : i32
    %c0_i32_1 = arith.constant 0 : i32
    return %c0_i32, %c0_i32_0 : i32, i32
  }
  func.func @transform_7(%arg0: i32) -> i32 {
    %c0_i32 = arith.constant 0 : i32
    %c0_i32_0 = arith.constant 0 : i32
    return %c0_i32 : i32
  }
  func.func @transform_8(%arg0: i32) -> (i32, i32, i32) {
    %c0_i32 = arith.constant 0 : i32
    %c0_i32_0 = arith.constant 0 : i32
    %c0_i32_1 = arith.constant 0 : i32
    return %arg0, %c0_i32, %c0_i32_0 : i32, i32, i32
  }
}

</mosaic_0001>

<bundles_post_ra>
// kernel: self_attn_forward.1
= control target key start
LH: loop header
LB: loop body
LE: loop exit
PB: predicated region body
PF: predicated region fallthrough
CT: control target
= control target key end

     0   :  { %s2093_s29 = smov 0   ;;  %s2799_s0 = inlined_call_operand.vmem [shape: f32[2,32,256], index: 0, kind: input, shape index: {}]   ;;  %s2800_s1 = inlined_call_operand.vmem [shape: f32[4,32], index: 1, kind: input, shape index: {}]   ;;  %s2801_s2 = inlined_call_operand.vmem [shape: f32[4,32], index: 2, kind: input, shape index: {}]   ;;  %s2802_s3 = inlined_call_operand.vmem [shape: f32[32,32], index: 3, kind: input, shape index: {}]   ;;  %s2803_s4 = inlined_call_operand.vmem [shape: f32[4,1], index: 4, kind: input, shape index: {}]   ;;  %s2804_s5 = inlined_call_operand.vmem [shape: f32[4,1], index: 5, kind: input, shape index: {}]   ;;  %s2805_s6 = inlined_call_operand.vmem [shape: f32[32,1], index: 6, kind: input, shape index: {}]   ;;  %s2806_s7 = inlined_call_operand.<no memory space> [shape: f32[1], index: 7, kind: input, shape index: {}]   ;;  %s2807_s8 = inlined_call_operand.vmem [shape: f32[2,32,256], index: 8, kind: output, shape index: {}]  }
   0x1   :  { %13 = sst [smem:[#allocation2]] %s2806_s7 }
   0x2 LB: > { %s1682_s30 = sadd.s32 4294967295, %s2041_s29   ;;  %p1686_p0 = scmp.ge.s32.totalorder %s2041_s29, 1  ;;  %s2041_s29 = sphi %s2093_s29, %s19_s29  }
   0x3   : > { %p263_p1 = scmp.lt.s32.totalorder %s2041_s29, 3 }
   0x5   : > { %p264_p2 = pnand %p1686_p0, %p263_p1 }
   0x7   : > { %267 = sbr.rel (%p264_p2) target bundleno = 1335 (0x537), region = 52 }
   0xe   : > { %p297_p3 = scmp.lt.s32.totalorder %s1682_s30, 1  ;;  %v2808_v0 = vmov 0.0   ;;  %v2044_v1 = vmov 0   ;;  %v316_v2 = vld [vmem:[%s2803_s4] sm:$0xf]  ;;  %vm322_vm0 = vcmask 261120  }
   0xf   : > { %390 = vmatprep.mubr.f32.mxu0 %v2808_v0  ;;  %1833 = vset.pattern.permute.xlu0 %v2044_v1  ;;  %v398_v3 = vld [vmem:[%s2804_s5] sm:$0xf]  ;;  %vm768_vm1 = vcmask 1043456   ;;  %vm671_vm2 = vcmask 31744   ;;  %s1601_s17 = sld [smem:[#allocation2]] }
  0x10   : > { %s2894_s30 = smov (!%p297_p3, %s1682_s30), 1  ;;  %319 = vperm.xlu0 %1833, %v316_v2   ;;  %839 = vmatprep.mubr.f32.mxu1 %v2808_v0  ;;  %v315_v16 = vld [vmem:[%s2800_s1] sm:$0xf] }
  0x11   : > { %s1733_s12 = sshll.u32 %s2894_s30, 6  ;;  %v397_v17 = vld [vmem:[%s2801_s2] sm:$0xf] }
  0x12   : > { %s2117_s15 = scalar_lea.vmem %s2799_s0, %s1733_s12  ;;  %s2778_s20 = scalar_lea.vmem %s2807_s8, %s1733_s12 }
  0x13   : > { %v308_v4 = vld [vmem:[%s2117_s15 + $0x8] sm:$0xff]  ;;  %v310_v5 = vld [vmem:[%s2117_s15 + $0x18] sm:$0xff]  ;;  %v307_v6 = vld [vmem:[%s2117_s15] sm:$0xff] }
  0x14   : > { %401 = vperm.xlu0 %1833, %v398_v3   ;;  %v1735_v7 = vpack.c.bf16 %v310_v5, %v308_v4  ;;  %v309_v8 = vld [vmem:[%s2117_s15 + $0x10] sm:$0xff]  ;;  %v312_v9 = vld [vmem:[%s2117_s15 + $0x28] sm:$0xff]  ;;  %v314_v10 = vld [vmem:[%s2117_s15 + $0x38] sm:$0xff] }
  0x15   : > { %v1737_v11 = vpack.c.bf16 %v309_v8, %v307_v6  ;;  %v1739_v12 = vpack.c.bf16 %v314_v10, %v312_v9  ;;  %v311_v13 = vld [vmem:[%s2117_s15 + $0x20] sm:$0xff]  ;;  %v313_v14 = vld [vmem:[%s2117_s15 + $0x30] sm:$0xff] }
  0x16   : > { %1736 = vmatprep.subr.bf16.mxu0 %v1735_v7  ;;  %v1741_v15 = vpack.c.bf16 %v313_v14, %v311_v13 }
  0x17   : > { %1738 = vmatpush1.bf16.msra.mxu0 %v1737_v11 }
  0x18   : > { %1740 = vmatprep.subr.bf16.mxu0 %v1739_v12 }
  0x1b   : > { %1742 = vmatpush1.bf16.msra.mxu0 %v1741_v15 }
  0x1c   : > { %1744 = vmatprep.subr.bf16.mxu0 %v1735_v7 }
  0x1e   : > { %1691 = vmatmul.mubr.msk.f32.vlgmr.msra.gmra.mrb[0].mxu0 %vm322_vm0, %v315_v16 }
  0x1f   : > { %1746 = vmatpush1.bf16.msra.mxu0 %v1737_v11  ;;  %471 = vmatprep.mubr.f32.mxu0 %v2808_v0 }
  0x20   : > { %1748 = vmatprep.subr.bf16.mxu0 %v1739_v12 }
  0x23   : > { %1750 = vmatpush1.bf16.msra.mxu0 %v1741_v15 }
  0x24   : > { %1752 = vmatprep.subr.bf16.mxu0 %v1735_v7 }
  0x26   : > { %1692 = vmatmul.mubr.msk.f32.vlgmr.msra.gmra.mrb[2].mxu0 %vm322_vm0, %v397_v17 }
  0x27   : > { %1754 = vmatpush1.bf16.msra.mxu0 %v1737_v11  ;;  %582 = vmatprep.mubr.f32.mxu0 %v2808_v0 }
  0x28   : > { %1756 = vmatprep.subr.bf16.mxu0 %v1739_v12 }
  0x2b   : > { %1758 = vmatpush1.bf16.msra.mxu0 %v1741_v15 }
  0x8f   : > { %v320_v18 = vpop.permute.xlu0 %319 }
  0x93   : > { %v402_v23 = vpop.permute.xlu0 %401 }
  0xf1   : > { %v392_v19 = vpop.f32.mrb[0].mxu0 }
  0xf2   : > { %v394_v20 = vpop.f32.mrb[1].mxu0  ;;  %v393_v21 = vadd.f32 %v392_v19, %v320_v18 }
  0xf3   : > { %v395_v27 = vadd.f32 %v394_v20, %v320_v18 }
  0xf4   : > { %607 = vxpose.xlu1.b32.start.end [1/1] (short) %v393_v21, 128 }
  0xf9   : > { %v473_v22 = vpop.f32.mrb[2].mxu0 }
  0xfa   : > { %v475_v24 = vpop.f32.mrb[3].mxu0  ;;  %v474_v26 = vadd.f32 %v473_v22, %v402_v23 }
  0xfb   : > { %v476_v25 = vadd.f32 %v475_v24, %v402_v23 }
  0xfd   : > { %1697 = vmatprep.subr.msk.mxu1 %vm768_vm1, %v476_v25 }
  0xfe   : > { %1698 = vmatpush1.msk.msra.mxu1 %vm768_vm1, %v474_v26 }
 0x131   : > { %639 = vxpose.xlu1.b32.start.end [1/1] (short) %v395_v27, 128 }
 0x14f   : > { %1834 = vset.pattern.permute.xlu1 %v2044_v1 }
 0x174   : > { %v623_v28 = vpop.trf.xlu1 }
 0x175   : > { %1699 = vmatmul.mubr.msk.f32.vlgmr.msra.gmra.mrb[0].mxu1 %vm671_vm2, %v623_v28 }
 0x176   : > { %845 = vmatprep.mubr.f32.mxu1 %v2808_v0 }
 0x178   : > { %v624_v29 = vpop.trf.xlu1 }
 0x179   : > { %1700 = vmatmul.mubr.msk.f32.gmra.mrb[2].mxu1 %vm671_vm2, %v624_v29 }
 0x17a   : > { %851 = vmatprep.mubr.f32.mxu1 %v2808_v0 }
 0x17c   : > { %v625_v30 = vpop.trf.xlu1 }
 0x17d   : > { %1701 = vmatmul.mubr.msk.f32.gmra.mrb[4].mxu1 %vm671_vm2, %v625_v30 }
 0x17e   : > { %857 = vmatprep.mubr.f32.mxu1 %v2808_v0 }
 0x180   : > { %v626_v31 = vpop.trf.xlu1 }
 0x181   : > { %1702 = vmatmul.mubr.msk.f32.gmra.mrb[6].mxu1 %vm671_vm2, %v626_v31 }
 0x182   : > { %863 = vmatprep.mubr.f32.mxu1 %v2808_v0 }
 0x184   : > { %v627_v32 = vpop.trf.xlu1 }
 0x185   : > { %1703 = vmatmul.mubr.msk.f32.gmra.mrb[8].mxu1 %vm671_vm2, %v627_v32 }
 0x186   : > { %869 = vmatprep.mubr.f32.mxu1 %v2808_v0 }
 0x188   : > { %v628_v33 = vpop.trf.xlu1 }
 0x189   : > { %1704 = vmatmul.mubr.msk.f32.gmra.mrb[10].mxu1 %vm671_vm2, %v628_v33 }
 0x18a   : > { %875 = vmatprep.mubr.f32.mxu1 %v2808_v0 }
 0x18c   : > { %v629_v34 = vpop.trf.xlu1 }
 0x18d   : > { %1705 = vmatmul.mubr.msk.f32.gmra.mrb[12].mxu1 %vm671_vm2, %v629_v34 }
 0x18e   : > { %881 = vmatprep.mubr.f32.mxu1 %v2808_v0 }
 0x190   : > { %v630_v35 = vpop.trf.xlu1 }
 0x191   : > { %1706 = vmatmul.mubr.msk.f32.gmra.mrb[14].mxu1 %vm671_vm2, %v630_v35 }
 0x192   : > { %887 = vmatprep.mubr.f32.mxu1 %v2808_v0 }
 0x194   : > { %v631_v36 = vpop.trf.xlu1 }
 0x195   : > { %1707 = vmatmul.mubr.msk.f32.gmra.mrb[16].mxu1 %vm671_vm2, %v631_v36 }
 0x196   : > { %893 = vmatprep.mubr.f32.mxu1 %v2808_v0 }
 0x198   : > { %v632_v37 = vpop.trf.xlu1 }
 0x199   : > { %1708 = vmatmul.mubr.msk.f32.gmra.mrb[18].mxu1 %vm671_vm2, %v632_v37 }
 0x19a   : > { %899 = vmatprep.mubr.f32.mxu1 %v2808_v0 }
 0x19c   : > { %v633_v38 = vpop.trf.xlu1 }
 0x19d   : > { %1709 = vmatmul.mubr.msk.f32.gmra.mrb[20].mxu1 %vm671_vm2, %v633_v38 }
 0x19e   : > { %905 = vmatprep.mubr.f32.mxu1 %v2808_v0 }
 0x1a0   : > { %v634_v39 = vpop.trf.xlu1 }
 0x1a1   : > { %1710 = vmatmul.mubr.msk.f32.gmra.mrb[22].mxu1 %vm671_vm2, %v634_v39 }
 0x1a2   : > { %911 = vmatprep.mubr.f32.mxu1 %v2808_v0 }
 0x1a4   : > { %v635_v40 = vpop.trf.xlu1 }
 0x1a5   : > { %1711 = vmatmul.mubr.msk.f32.gmra.mrb[24].mxu1 %vm671_vm2, %v635_v40 }
 0x1a6   : > { %917 = vmatprep.mubr.f32.mxu1 %v2808_v0 }
 0x1a8   : > { %v636_v41 = vpop.trf.xlu1 }
 0x1a9   : > { %1712 = vmatmul.mubr.msk.f32.gmra.mrb[26].mxu1 %vm671_vm2, %v636_v41 }
 0x1aa   : > { %923 = vmatprep.mubr.f32.mxu1 %v2808_v0 }
 0x1ac   : > { %v637_v42 = vpop.trf.xlu1 }
 0x1ad   : > { %1713 = vmatmul.mubr.msk.f32.gmra.mrb[28].mxu1 %vm671_vm2, %v637_v42 }
 0x1ae   : > { %929 = vmatprep.mubr.f32.mxu1 %v2808_v0 }
 0x1b0   : > { %v638_v43 = vpop.trf.xlu1 }
 0x1b1   : > { %1714 = vmatmul.mubr.msk.f32.gmra.mrb[30].mxu1 %vm671_vm2, %v638_v43 }
 0x1b2   : > { %935 = vmatprep.mubr.f32.mxu1 %v2808_v0 }
 0x1b4   : > { %v655_v44 = vpop.trf.xlu1 }
 0x1b5   : > { %1715 = vmatmul.mubr.msk.f32.gmra.mrb[32].mxu1 %vm671_vm2, %v655_v44 }
 0x1b6   : > { %941 = vmatprep.mubr.f32.mxu1 %v2808_v0 }
 0x1b8   : > { %v656_v45 = vpop.trf.xlu1 }
 0x1b9   : > { %1716 = vmatmul.mubr.msk.f32.gmra.mrb[34].mxu1 %vm671_vm2, %v656_v45 }
 0x1ba   : > { %947 = vmatprep.mubr.f32.mxu1 %v2808_v0 }
 0x1bc   : > { %v657_v46 = vpop.trf.xlu1 }
 0x1bd   : > { %1717 = vmatmul.mubr.msk.f32.gmra.mrb[36].mxu1 %vm671_vm2, %v657_v46 }
 0x1be   : > { %953 = vmatprep.mubr.f32.mxu1 %v2808_v0 }
 0x1c0   : > { %v658_v47 = vpop.trf.xlu1 }
 0x1c1   : > { %1718 = vmatmul.mubr.msk.f32.gmra.mrb[38].mxu1 %vm671_vm2, %v658_v47 }
 0x1c2   : > { %959 = vmatprep.mubr.f32.mxu1 %v2808_v0 }
 0x1c4   : > { %v659_v48 = vpop.trf.xlu1 }
 0x1c5   : > { %1719 = vmatmul.mubr.msk.f32.gmra.mrb[40].mxu1 %vm671_vm2, %v659_v48 }
 0x1c6   : > { %965 = vmatprep.mubr.f32.mxu1 %v2808_v0 }
 0x1c8   : > { %v660_v49 = vpop.trf.xlu1 }
 0x1c9   : > { %1720 = vmatmul.mubr.msk.f32.gmra.mrb[42].mxu1 %vm671_vm2, %v660_v49 }
 0x1ca   : > { %971 = vmatprep.mubr.f32.mxu1 %v2808_v0 }
 0x1cc   : > { %v661_v50 = vpop.trf.xlu1 }
 0x1cd   : > { %1721 = vmatmul.mubr.msk.f32.gmra.mrb[44].mxu1 %vm671_vm2, %v661_v50 }
 0x1ce   : > { %977 = vmatprep.mubr.f32.mxu1 %v2808_v0 }
 0x1d0   : > { %v662_v51 = vpop.trf.xlu1 }
 0x1d1   : > { %1722 = vmatmul.mubr.msk.f32.gmra.mrb[46].mxu1 %vm671_vm2, %v662_v51 }
 0x1d2   : > { %983 = vmatprep.mubr.f32.mxu1 %v2808_v0 }
 0x1d4   : > { %v663_v52 = vpop.trf.xlu1 }
 0x1d5   : > { %1723 = vmatmul.mubr.msk.f32.gmra.mrb[48].mxu1 %vm671_vm2, %v663_v52 }
 0x1d6   : > { %989 = vmatprep.mubr.f32.mxu1 %v2808_v0 }
 0x1d8   : > { %v664_v53 = vpop.trf.xlu1 }
 0x1d9   : > { %1724 = vmatmul.mubr.msk.f32.gmra.mrb[50].mxu1 %vm671_vm2, %v664_v53 }
 0x1da   : > { %995 = vmatprep.mubr.f32.mxu1 %v2808_v0 }
 0x1dc   : > { %v665_v54 = vpop.trf.xlu1 }
 0x1dd   : > { %1725 = vmatmul.mubr.msk.f32.gmra.mrb[52].mxu1 %vm671_vm2, %v665_v54 }
 0x1de   : > { %1001 = vmatprep.mubr.f32.mxu1 %v2808_v0 }
 0x1e0   : > { %v666_v55 = vpop.trf.xlu1 }
 0x1e1   : > { %1726 = vmatmul.mubr.msk.f32.gmra.mrb[54].mxu1 %vm671_vm2, %v666_v55 }
 0x1e2   : > { %1007 = vmatprep.mubr.f32.mxu1 %v2808_v0 }
 0x1e4   : > { %v667_v56 = vpop.trf.xlu1 }
 0x1e5   : > { %1727 = vmatmul.mubr.msk.f32.gmra.mrb[56].mxu1 %vm671_vm2, %v667_v56 }
 0x1e6   : > { %1013 = vmatprep.mubr.f32.mxu1 %v2808_v0 }
 0x1e8   : > { %v668_v57 = vpop.trf.xlu1 }
 0x1e9   : > { %1728 = vmatmul.mubr.msk.f32.gmra.mrb[58].mxu1 %vm671_vm2, %v668_v57 }
 0x1ea   : > { %1019 = vmatprep.mubr.f32.mxu1 %v2808_v0 }
 0x1ec   : > { %v669_v58 = vpop.trf.xlu1 }
 0x1ed   : > { %1729 = vmatmul.mubr.msk.f32.gmra.mrb[60].mxu1 %vm671_vm2, %v669_v58 }
 0x1ee   : > { %1025 = vmatprep.mubr.f32.mxu1 %v2808_v0 }
 0x1f0   : > { %v670_v59 = vpop.trf.xlu1 }
 0x1f1   : > { %1730 = vmatmul.mubr.msk.f32.gmra.mrb[62].mxu1 %vm671_vm2, %v670_v59 }
 0x248   : > { %v2200_v60 = vpop.f32.mrb[0].mxu1 }
 0x249   : > { %v2202_v61 = vpop.f32.mrb[1].mxu1 }
 0x24a   : > { %v1032_v62 = vmax.f32 %v2200_v60, %v2202_v61 }
 0x24c   : > { %1033 = vmax.xlane.f32.xlu0 %v1032_v62  ;;  %v2206_v63 = vpop.f32.mrb[2].mxu1 }
 0x24d   : > { %v2208_v1 = vpop.f32.mrb[3].mxu1 }
 0x24e   : > { %v1035_v2 = vmax.f32 %v2206_v63, %v2208_v1 }
 0x250   : > { %1036 = vmax.xlane.f32.xlu0 %v1035_v2  ;;  %v2212_v3 = vpop.f32.mrb[4].mxu1 }
 0x251   : > { %v2214_v4 = vpop.f32.mrb[5].mxu1 }
 0x252   : > { %v1038_v5 = vmax.f32 %v2212_v3, %v2214_v4 }
 0x254   : > { %1039 = vmax.xlane.f32.xlu0 %v1038_v5  ;;  %v2218_v6 = vpop.f32.mrb[6].mxu1 }
 0x255   : > { %v2220_v7 = vpop.f32.mrb[7].mxu1 }
 0x256   : > { %v1041_v8 = vmax.f32 %v2218_v6, %v2220_v7 }
 0x258   : > { %1042 = vmax.xlane.f32.xlu0 %v1041_v8  ;;  %v2224_v9 = vpop.f32.mrb[8].mxu1 }
 0x259   : > { %v2226_v10 = vpop.f32.mrb[9].mxu1 }
 0x25a   : > { %v1044_v11 = vmax.f32 %v2224_v9, %v2226_v10 }
 0x25c   : > { %1045 = vmax.xlane.f32.xlu0 %v1044_v11  ;;  %v2230_v12 = vpop.f32.mrb[10].mxu1 }
 0x25d   : > { %v2232_v13 = vpop.f32.mrb[11].mxu1 }
 0x25e   : > { %v1047_v14 = vmax.f32 %v2230_v12, %v2232_v13 }
 0x260   : > { %1048 = vmax.xlane.f32.xlu0 %v1047_v14  ;;  %v2236_v15 = vpop.f32.mrb[12].mxu1 }
 0x261   : > { %v2238_v16 = vpop.f32.mrb[13].mxu1 }
 0x262   : > { %v1050_v17 = vmax.f32 %v2236_v15, %v2238_v16 }
 0x264   : > { %1051 = vmax.xlane.f32.xlu0 %v1050_v17  ;;  %v2242_v18 = vpop.f32.mrb[14].mxu1 }
 0x265   : > { %v2244_v19 = vpop.f32.mrb[15].mxu1 }
 0x266   : > { %v1053_v20 = vmax.f32 %v2242_v18, %v2244_v19 }
 0x268   : > { %1054 = vmax.xlane.f32.xlu0 %v1053_v20  ;;  %v2248_v21 = vpop.f32.mrb[16].mxu1 }
 0x269   : > { %v2250_v22 = vpop.f32.mrb[17].mxu1 }
 0x26a   : > { %v1056_v23 = vmax.f32 %v2248_v21, %v2250_v22 }
 0x26c   : > { %1057 = vmax.xlane.f32.xlu1 %v1056_v23  ;;  %v2254_v24 = vpop.f32.mrb[18].mxu1 }
 0x26d   : > { %v2256_v25 = vpop.f32.mrb[19].mxu1 }
 0x26e   : > { %v1059_v26 = vmax.f32 %v2254_v24, %v2256_v25 }
 0x270   : > { %1060 = vmax.xlane.f32.xlu0 %v1059_v26  ;;  %v2260_v27 = vpop.f32.mrb[20].mxu1 }
 0x271   : > { %v2262_v28 = vpop.f32.mrb[21].mxu1 }
 0x272   : > { %v1062_v29 = vmax.f32 %v2260_v27, %v2262_v28 }
 0x274   : > { %1063 = vmax.xlane.f32.xlu0 %v1062_v29  ;;  %v2266_v30 = vpop.f32.mrb[22].mxu1 }
 0x275   : > { %v2268_v31 = vpop.f32.mrb[23].mxu1 }
 0x276   : > { %v1065_v32 = vmax.f32 %v2266_v30, %v2268_v31 }
 0x278   : > { %1066 = vmax.xlane.f32.xlu0 %v1065_v32  ;;  %v2272_v33 = vpop.f32.mrb[24].mxu1 }
 0x279   : > { %v2274_v34 = vpop.f32.mrb[25].mxu1 }
 0x27a   : > { %v1068_v35 = vmax.f32 %v2272_v33, %v2274_v34 }
 0x27c   : > { %1069 = vmax.xlane.f32.xlu0 %v1068_v35  ;;  %v2278_v36 = vpop.f32.mrb[26].mxu1 }
 0x27d   : > { %v2280_v37 = vpop.f32.mrb[27].mxu1 }
 0x27e   : > { %v1071_v38 = vmax.f32 %v2278_v36, %v2280_v37 }
 0x280   : > { %1072 = vmax.xlane.f32.xlu0 %v1071_v38  ;;  %v2284_v39 = vpop.f32.mrb[28].mxu1 }
 0x281   : > { %v2286_v40 = vpop.f32.mrb[29].mxu1 }
 0x282   : > { %v1074_v41 = vmax.f32 %v2284_v39, %v2286_v40 }
 0x284   : > { %1075 = vmax.xlane.f32.xlu0 %v1074_v41  ;;  %v2290_v42 = vpop.f32.mrb[30].mxu1 }
 0x285   : > { %v2292_v43 = vpop.f32.mrb[31].mxu1 }
 0x286   : > { %v1077_v44 = vmax.f32 %v2290_v42, %v2292_v43 }
 0x288   : > { %1078 = vmax.xlane.f32.xlu0 %v1077_v44  ;;  %v2296_v45 = vpop.f32.mrb[32].mxu1 }
 0x289   : > { %v2298_v46 = vpop.f32.mrb[33].mxu1 }
 0x28a   : > { %v1080_v47 = vmax.f32 %v2296_v45, %v2298_v46 }
 0x28c   : > { %1081 = vmax.xlane.f32.xlu0 %v1080_v47  ;;  %v2302_v48 = vpop.f32.mrb[34].mxu1 }
 0x28d   : > { %v2304_v49 = vpop.f32.mrb[35].mxu1 }
 0x28e   : > { %v1083_v50 = vmax.f32 %v2302_v48, %v2304_v49 }
 0x290   : > { %1084 = vmax.xlane.f32.xlu0 %v1083_v50  ;;  %v2308_v51 = vpop.f32.mrb[36].mxu1  ;;  %v478_v50 = vld [vmem:[%s2802_s3] sm:$0xff] }
 0x291   : > { %v2310_v52 = vpop.f32.mrb[37].mxu1  ;;  %1693 = vmatmul.mubr.msk.f32.vlgmr.msra.gmra.mrb[4].mxu0 %vm322_vm0, %v478_v50 }
 0x292   : > { %v1086_v53 = vmax.f32 %v2308_v51, %v2310_v52  ;;  %588 = vmatprep.mubr.f32.mxu0 %v2808_v0 }
 0x294   : > { %1087 = vmax.xlane.f32.xlu0 %v1086_v53  ;;  %v2314_v54 = vpop.f32.mrb[38].mxu1 }
 0x295   : > { %v2316_v55 = vpop.f32.mrb[39].mxu1 }
 0x296   : > { %v1089_v56 = vmax.f32 %v2314_v54, %v2316_v55 }
 0x298   : > { %1090 = vmax.xlane.f32.xlu0 %v1089_v56  ;;  %v2320_v57 = vpop.f32.mrb[40].mxu1 }
 0x299   : > { %v2322_v58 = vpop.f32.mrb[41].mxu1 }
 0x29a   : > { %v1092_v59 = vmax.f32 %v2320_v57, %v2322_v58 }
 0x29c   : > { %1093 = vmax.xlane.f32.xlu0 %v1092_v59  ;;  %v2326_v62 = vpop.f32.mrb[42].mxu1 }
 0x29d   : > { %v2328_v2 = vpop.f32.mrb[43].mxu1 }
 0x29e   : > { %v1095_v5 = vmax.f32 %v2326_v62, %v2328_v2 }
 0x2a0   : > { %1096 = vmax.xlane.f32.xlu0 %v1095_v5  ;;  %v2332_v8 = vpop.f32.mrb[44].mxu1 }
 0x2a1   : > { %v2334_v11 = vpop.f32.mrb[45].mxu1 }
 0x2a2   : > { %v1098_v14 = vmax.f32 %v2332_v8, %v2334_v11 }
 0x2a4   : > { %1099 = vmax.xlane.f32.xlu0 %v1098_v14  ;;  %v2338_v17 = vpop.f32.mrb[46].mxu1 }
 0x2a5   : > { %v2340_v20 = vpop.f32.mrb[47].mxu1 }
 0x2a6   : > { %2836 = vst [vmem:[#allocation3_spill] sm:$0xff] %v2340_v20  ;;  %v1101_v23 = vmax.f32 %v2338_v17, %v2340_v20 }
 0x2a8   : > { %1102 = vmax.xlane.f32.xlu0 %v1101_v23  ;;  %v2344_v26 = vpop.f32.mrb[48].mxu1 }
 0x2a9   : > { %2837 = vst [vmem:[#allocation4_spill] sm:$0xff] %v2344_v26  ;;  %v2346_v29 = vpop.f32.mrb[49].mxu1 }
 0x2aa   : > { %2838 = vst [vmem:[#allocation5_spill] sm:$0xff] %v2346_v29  ;;  %v1104_v32 = vmax.f32 %v2344_v26, %v2346_v29 }
 0x2ac   : > { %1105 = vmax.xlane.f32.xlu0 %v1104_v32  ;;  %v2350_v35 = vpop.f32.mrb[50].mxu1 }
 0x2ad   : > { %2839 = vst [vmem:[#allocation6_spill] sm:$0xff] %v2350_v35  ;;  %v2352_v38 = vpop.f32.mrb[51].mxu1 }
 0x2ae   : > { %2840 = vst [vmem:[#allocation7_spill] sm:$0xff] %v2352_v38  ;;  %v1107_v41 = vmax.f32 %v2350_v35, %v2352_v38 }
 0x2b0   : > { %1108 = vmax.xlane.f32.xlu0 %v1107_v41  ;;  %v2356_v44 = vpop.f32.mrb[52].mxu1 }
 0x2b1   : > { %2841 = vst [vmem:[#allocation8_spill] sm:$0xff] %v2356_v44  ;;  %v2358_v47 = vpop.f32.mrb[53].mxu1 }
 0x2b2   : > { %2842 = vst [vmem:[#allocation9_spill] sm:$0xff] %v2358_v47  ;;  %v1110_v53 = vmax.f32 %v2356_v44, %v2358_v47 }
 0x2b4   : > { %1111 = vmax.xlane.f32.xlu0 %v1110_v53  ;;  %v2367_v56 = vpop.f32.mrb[54].mxu1  ;;  %v2849_v53 = vmov 0.0  }
 0x2b5   : > { %2843 = vst [vmem:[#allocation10_spill] sm:$0xff] %v2367_v56  ;;  %v2369_v59 = vpop.f32.mrb[55].mxu1 }
 0x2b6   : > { %2844 = vst [vmem:[#allocation11_spill] sm:$0xff] %v2369_v59  ;;  %v1113_v5 = vmax.f32 %v2367_v56, %v2369_v59 }
 0x2b8   : > { %1114 = vmax.xlane.f32.xlu0 %v1113_v5  ;;  %v2373_v14 = vpop.f32.mrb[56].mxu1 }
 0x2b9   : > { %2845 = vst [vmem:[#allocation12_spill] sm:$0xff] %v2373_v14  ;;  %v2375_v23 = vpop.f32.mrb[57].mxu1 }
 0x2ba   : > { %2846 = vst [vmem:[#allocation13_spill] sm:$0xff] %v2375_v23  ;;  %v1116_v32 = vmax.f32 %v2373_v14, %v2375_v23  ;;  %v479_v23 = vld [vmem:[%s2802_s3 + $0x8] sm:$0xff] }
 0x2bb   : > { %1694 = vmatmul.mubr.msk.f32.gmra.mrb[6].mxu0 %vm322_vm0, %v479_v23 }
 0x2bc   : > { %1117 = vmax.xlane.f32.xlu1 %v1116_v32  ;;  %v2379_v41 = vpop.f32.mrb[58].mxu1  ;;  %594 = vmatprep.mubr.f32.mxu0 %v2849_v53 }
 0x2bd   : > { %v2381_v50 = vpop.f32.mrb[59].mxu1 }
 0x2c0   : > { %v2385_v0 = vpop.f32.mrb[60].mxu1 }
 0x2c1   : > { %2847 = vst [vmem:[#allocation14_spill] sm:$0xff] %v2385_v0  ;;  %v2387_v47 = vpop.f32.mrb[61].mxu1 }
 0x2c2   : > { %2848 = vst [vmem:[#allocation15_spill] sm:$0xff] %v2387_v47  ;;  %v1122_v5 = vmax.f32 %v2385_v0, %v2387_v47  ;;  %v480_v47 = vld [vmem:[%s2802_s3 + $0x10] sm:$0xff] }
 0x2c3   : > { %1695 = vmatmul.mubr.msk.f32.gmra.mrb[8].mxu0 %vm322_vm0, %v480_v47 }
 0x2c4   : > { %1123 = vmax.xlane.f32.xlu1 %v1122_v5  ;;  %v2391_v59 = vpop.f32.mrb[62].mxu1  ;;  %600 = vmatprep.mubr.f32.mxu0 %v2849_v53  ;;  %v481_v5 = vld [vmem:[%s2802_s3 + $0x18] sm:$0xff] }
 0x2c5   : > { %v2393_v56 = vpop.f32.mrb[63].mxu1 }
 0x2c7   : > { %1696 = vmatmul.mubr.msk.f32.gmra.mrb[10].mxu0 %vm322_vm0, %v481_v5 }
 0x2d9   : > { %v1034_v32 = vpop.xlane.xlu0 %1033 }
 0x2da   : > { %v1128_v0 = vsub.f32 %v2200_v60, %v1034_v32  ;;  %v1129_v23 = vsub.f32 %v2202_v61, %v1034_v32 }
 0x2dc   : > { %v1192_v14 = vmul.f32 1.442695, %v1128_v0  ;;  %v1194_v44 = vmul.f32 1.442695, %v1129_v23 }
 0x2dd   : > { %v1037_v38 = vpop.xlane.xlu0 %1036 }
 0x2de   : > { %1835 = vpow2.f32 %v1192_v14  ;;  %v1130_v35 = vsub.f32 %v2206_v63, %v1037_v38  ;;  %v1131_v47 = vsub.f32 %v2208_v1, %v1037_v38 }
 0x2df   : > { %1837 = vpow2.f32 %v1194_v44 }
 0x2e0   : > { %v1196_v53 = vmul.f32 1.442695, %v1130_v35  ;;  %v1198_v29 = vmul.f32 1.442695, %v1131_v47 }
 0x2e1   : > { %v1040_v26 = vpop.xlane.xlu0 %1039 }
 0x2e2   : > { %1839 = vpow2.f32 %v1196_v53  ;;  %v1132_v5 = vsub.f32 %v2212_v3, %v1040_v26  ;;  %v1133_v20 = vsub.f32 %v2214_v4, %v1040_v26 }
 0x2e3   : > { %1841 = vpow2.f32 %v1198_v29 }
 0x2e4   : > { %v1200_v60 = vmul.f32 1.442695, %v1132_v5  ;;  %v1202_v61 = vmul.f32 1.442695, %v1133_v20 }
 0x2e5   : > { %v1043_v0 = vpop.xlane.xlu0 %1042 }
 0x2e6   : > { %1843 = vpow2.f32 %v1200_v60  ;;  %v1134_v14 = vsub.f32 %v2218_v6, %v1043_v0  ;;  %v1135_v63 = vsub.f32 %v2220_v7, %v1043_v0 }
 0x2e7   : > { %1845 = vpow2.f32 %v1202_v61 }
 0x2e8   : > { %v2419_v1 = vpop.eup %1835  ;;  %v1204_v35 = vmul.f32 1.442695, %v1134_v14  ;;  %v1206_v38 = vmul.f32 1.442695, %v1135_v63 }
 0x2e9   : > { %v2421_v44 = vpop.eup %1837  ;;  %v1046_v32 = vpop.xlane.xlu0 %1045 }
 0x2ea   : > { %1847 = vpow2.f32 %v1204_v35  ;;  %v1136_v3 = vsub.f32 %v2224_v9, %v1046_v32  ;;  %v1137_v4 = vsub.f32 %v2226_v10, %v1046_v32  ;;  %v1320_v20 = vadd.f32 %v2421_v44, %v2419_v1 }
 0x2eb   : > { %1849 = vpow2.f32 %v1206_v38 }
 0x2ec   : > { %v2427_v6 = vpop.eup %1839  ;;  %v1208_v7 = vmul.f32 1.442695, %v1136_v3  ;;  %v1210_v26 = vmul.f32 1.442695, %v1137_v4  ;;  %1321 = vadd.xlane.f32.xlu0 %v1320_v20 }
 0x2ed   : > { %v2429_v29 = vpop.eup %1841  ;;  %v1049_v23 = vpop.xlane.xlu0 %1048 }
 0x2ee   : > { %1851 = vpow2.f32 %v1208_v7  ;;  %v1138_v47 = vsub.f32 %v2230_v12, %v1049_v23  ;;  %v1139_v53 = vsub.f32 %v2232_v13, %v1049_v23  ;;  %v1323_v9 = vadd.f32 %v2429_v29, %v2427_v6 }
 0x2ef   : > { %1853 = vpow2.f32 %v1210_v26 }
 0x2f0   : > { %v2435_v10 = vpop.eup %1843  ;;  %v1212_v5 = vmul.f32 1.442695, %v1138_v47  ;;  %v1214_v60 = vmul.f32 1.442695, %v1139_v53  ;;  %1324 = vadd.xlane.f32.xlu0 %v1323_v9 }
 0x2f1   : > { %v2437_v61 = vpop.eup %1845  ;;  %v1052_v0 = vpop.xlane.xlu0 %1051 }
 0x2f2   : > { %1855 = vpow2.f32 %v1212_v5  ;;  %v1140_v14 = vsub.f32 %v2236_v15, %v1052_v0  ;;  %v1141_v63 = vsub.f32 %v2238_v16, %v1052_v0  ;;  %v1326_v12 = vadd.f32 %v2437_v61, %v2435_v10 }
 0x2f3   : > { %1857 = vpow2.f32 %v1214_v60 }
 0x2f4   : > { %v2443_v13 = vpop.eup %1847  ;;  %v1216_v35 = vmul.f32 1.442695, %v1140_v14  ;;  %v1218_v38 = vmul.f32 1.442695, %v1141_v63  ;;  %1327 = vadd.xlane.f32.xlu0 %v1326_v12 }
 0x2f5   : > { %v2445_v32 = vpop.eup %1849  ;;  %v1055_v3 = vpop.xlane.xlu0 %1054 }
 0x2f6   : > { %1859 = vpow2.f32 %v1216_v35  ;;  %v1142_v4 = vsub.f32 %v2242_v18, %v1055_v3  ;;  %v1143_v20 = vsub.f32 %v2244_v19, %v1055_v3  ;;  %v1329_v15 = vadd.f32 %v2445_v32, %v2443_v13 }
 0x2f7   : > { %1861 = vpow2.f32 %v1218_v38 }
 0x2f8   : > { %v2451_v16 = vpop.eup %1851  ;;  %v1220_v7 = vmul.f32 1.442695, %v1142_v4  ;;  %v1222_v26 = vmul.f32 1.442695, %v1143_v20  ;;  %1330 = vadd.xlane.f32.xlu0 %v1329_v15 }
 0x2f9   : > { %v2453_v23 = vpop.eup %1853  ;;  %v1058_v47 = vpop.xlane.xlu1 %1057 }
 0x2fa   : > { %1863 = vpow2.f32 %v1220_v7  ;;  %v1144_v53 = vsub.f32 %v2248_v21, %v1058_v47  ;;  %v1145_v9 = vsub.f32 %v2250_v22, %v1058_v47  ;;  %v1332_v18 = vadd.f32 %v2453_v23, %v2451_v16 }
 0x2fb   : > { %1865 = vpow2.f32 %v1222_v26  ;;  %v2850_v47 = vmax.f32 %v2379_v41, %v2381_v50 }
 0x2fc   : > { %v2459_v19 = vpop.eup %1855  ;;  %v1224_v5 = vmul.f32 1.442695, %v1144_v53  ;;  %v1226_v60 = vmul.f32 1.442695, %v1145_v9  ;;  %1333 = vadd.xlane.f32.xlu0 %v1332_v18 }
 0x2fd   : > { %v2461_v0 = vpop.eup %1857  ;;  %v1061_v14 = vpop.xlane.xlu0 %1060 }
 0x2fe   : > { %1867 = vpow2.f32 %v1224_v5  ;;  %v1146_v63 = vsub.f32 %v2254_v24, %v1061_v14  ;;  %v1147_v12 = vsub.f32 %v2256_v25, %v1061_v14  ;;  %v1335_v21 = vadd.f32 %v2461_v0, %v2459_v19 }
 0x2ff   : > { %1869 = vpow2.f32 %v1226_v60 }
 0x300   : > { %v2467_v22 = vpop.eup %1859  ;;  %v1228_v35 = vmul.f32 1.442695, %v1146_v63  ;;  %v1230_v38 = vmul.f32 1.442695, %v1147_v12  ;;  %1336 = vadd.xlane.f32.xlu0 %v1335_v21 }
 0x301   : > { %v2469_v3 = vpop.eup %1861  ;;  %v1064_v4 = vpop.xlane.xlu0 %1063 }
 0x302   : > { %1871 = vpow2.f32 %v1228_v35  ;;  %v1148_v20 = vsub.f32 %v2260_v27, %v1064_v4  ;;  %v1149_v15 = vsub.f32 %v2262_v28, %v1064_v4  ;;  %v1338_v24 = vadd.f32 %v2469_v3, %v2467_v22 }
 0x303   : > { %1873 = vpow2.f32 %v1230_v38 }
 0x304   : > { %v2475_v25 = vpop.eup %1863  ;;  %v1232_v7 = vmul.f32 1.442695, %v1148_v20  ;;  %v1234_v26 = vmul.f32 1.442695, %v1149_v15  ;;  %1120 = vmax.xlane.f32.xlu0 %v2850_v47  ;;  %1339 = vadd.xlane.f32.xlu1 %v1338_v24  ;;  %v2851_v20 = vmax.f32 %v2391_v59, %v2393_v56 }
 0x305   : > { %v2480_v53 = vpop.eup %1865  ;;  %v1067_v9 = vpop.xlane.xlu0 %1066 }
 0x306   : > { %1875 = vpow2.f32 %v1232_v7  ;;  %v1150_v27 = vsub.f32 %v2266_v30, %v1067_v9  ;;  %v1151_v28 = vsub.f32 %v2268_v31, %v1067_v9  ;;  %v1341_v18 = vadd.f32 %v2480_v53, %v2475_v25 }
 0x307   : > { %1877 = vpow2.f32 %v1234_v26 }
 0x308   : > { %v2486_v5 = vpop.eup %1867  ;;  %v1236_v60 = vmul.f32 1.442695, %v1150_v27  ;;  %v1238_v14 = vmul.f32 1.442695, %v1151_v28  ;;  %1342 = vadd.xlane.f32.xlu0 %v1341_v18 }
 0x309   : > { %v2488_v63 = vpop.eup %1869  ;;  %v1070_v12 = vpop.xlane.xlu0 %1069 }
 0x30a   : > { %1879 = vpow2.f32 %v1236_v60  ;;  %v1152_v21 = vsub.f32 %v2272_v33, %v1070_v12  ;;  %v1153_v35 = vsub.f32 %v2274_v34, %v1070_v12  ;;  %v1344_v30 = vadd.f32 %v2488_v63, %v2486_v5 }
 0x30b   : > { %1881 = vpow2.f32 %v1238_v14 }
 0x30c   : > { %v2494_v31 = vpop.eup %1871  ;;  %v1240_v38 = vmul.f32 1.442695, %v1152_v21  ;;  %v1242_v4 = vmul.f32 1.442695, %v1153_v35  ;;  %1126 = vmax.xlane.f32.xlu0 %v2851_v20  ;;  %1345 = vadd.xlane.f32.xlu1 %v1344_v30 }
 0x30d   : > { %v2499_v15 = vpop.eup %1873  ;;  %v1073_v24 = vpop.xlane.xlu0 %1072 }
 0x30e   : > { %1883 = vpow2.f32 %v1240_v38  ;;  %v1154_v33 = vsub.f32 %v2278_v36, %v1073_v24  ;;  %v1155_v34 = vsub.f32 %v2280_v37, %v1073_v24  ;;  %v1347_v7 = vadd.f32 %v2499_v15, %v2494_v31 }
 0x30f   : > { %1885 = vpow2.f32 %v1242_v4 }
 0x310   : > { %v2505_v26 = vpop.eup %1875  ;;  %v1244_v47 = vmul.f32 1.442695, %v1154_v33  ;;  %v1246_v9 = vmul.f32 1.442695, %v1155_v34  ;;  %1348 = vadd.xlane.f32.xlu0 %v1347_v7 }
 0x311   : > { %v2507_v27 = vpop.eup %1877  ;;  %v1076_v28 = vpop.xlane.xlu0 %1075 }
 0x312   : > { %1887 = vpow2.f32 %v1244_v47  ;;  %v1156_v18 = vsub.f32 %v2284_v39, %v1076_v28  ;;  %v1157_v60 = vsub.f32 %v2286_v40, %v1076_v28  ;;  %v1350_v36 = vadd.f32 %v2507_v27, %v2505_v26 }
 0x313   : > { %1889 = vpow2.f32 %v1246_v9 }
 0x314   : > { %v2513_v37 = vpop.eup %1879  ;;  %v1248_v14 = vmul.f32 1.442695, %v1156_v18  ;;  %v1250_v12 = vmul.f32 1.442695, %v1157_v60  ;;  %1351 = vadd.xlane.f32.xlu1 %v1350_v36 }
 0x315   : > { %v2515_v21 = vpop.eup %1881  ;;  %v1079_v35 = vpop.xlane.xlu0 %1078 }
 0x316   : > { %1891 = vpow2.f32 %v1248_v14  ;;  %v1158_v30 = vsub.f32 %v2290_v42, %v1079_v35  ;;  %v1159_v38 = vsub.f32 %v2292_v43, %v1079_v35  ;;  %v1353_v39 = vadd.f32 %v2515_v21, %v2513_v37 }
 0x317   : > { %1893 = vpow2.f32 %v1250_v12 }
 0x318   : > { %v2521_v40 = vpop.eup %1883  ;;  %v1252_v4 = vmul.f32 1.442695, %v1158_v30  ;;  %v1254_v20 = vmul.f32 1.442695, %v1159_v38  ;;  %1354 = vadd.xlane.f32.xlu0 %v1353_v39 }
 0x319   : > { %v2523_v24 = vpop.eup %1885  ;;  %v1082_v33 = vpop.xlane.xlu0 %1081 }
 0x31a   : > { %1895 = vpow2.f32 %v1252_v4  ;;  %v1160_v34 = vsub.f32 %v2296_v45, %v1082_v33  ;;  %v1161_v7 = vsub.f32 %v2298_v46, %v1082_v33  ;;  %v1356_v42 = vadd.f32 %v2523_v24, %v2521_v40 }
 0x31b   : > { %1897 = vpow2.f32 %v1254_v20 }
 0x31c   : > { %v2529_v43 = vpop.eup %1887  ;;  %v1256_v47 = vmul.f32 1.442695, %v1160_v34  ;;  %v1258_v9 = vmul.f32 1.442695, %v1161_v7  ;;  %1357 = vadd.xlane.f32.xlu1 %v1356_v42 }
 0x31d   : > { %v2531_v28 = vpop.eup %1889  ;;  %v1085_v18 = vpop.xlane.xlu0 %1084 }
 0x31e   : > { %1899 = vpow2.f32 %v1256_v47  ;;  %v1162_v60 = vsub.f32 %v2302_v48, %v1085_v18  ;;  %v1163_v36 = vsub.f32 %v2304_v49, %v1085_v18  ;;  %v1359_v45 = vadd.f32 %v2531_v28, %v2529_v43 }
 0x31f   : > { %1901 = vpow2.f32 %v1258_v9 }
 0x320   : > { %v2537_v46 = vpop.eup %1891  ;;  %v1260_v14 = vmul.f32 1.442695, %v1162_v60  ;;  %v1262_v12 = vmul.f32 1.442695, %v1163_v36  ;;  %1360 = vadd.xlane.f32.xlu0 %v1359_v45 }
 0x321   : > { %v2539_v35 = vpop.eup %1893  ;;  %v1088_v30 = vpop.xlane.xlu0 %1087 }
 0x322   : > { %1903 = vpow2.f32 %v1260_v14  ;;  %v1164_v38 = vsub.f32 %v2308_v51, %v1088_v30  ;;  %v1165_v39 = vsub.f32 %v2310_v52, %v1088_v30  ;;  %v1362_v48 = vadd.f32 %v2539_v35, %v2537_v46 }
 0x323   : > { %1905 = vpow2.f32 %v1262_v12 }
 0x324   : > { %v2545_v49 = vpop.eup %1895  ;;  %v1264_v4 = vmul.f32 1.442695, %v1164_v38  ;;  %v1266_v20 = vmul.f32 1.442695, %v1165_v39  ;;  %1363 = vadd.xlane.f32.xlu1 %v1362_v48 }
 0x325   : > { %v2547_v33 = vpop.eup %1897  ;;  %v1091_v34 = vpop.xlane.xlu0 %1090 }
 0x326   : > { %1907 = vpow2.f32 %v1264_v4  ;;  %v1166_v7 = vsub.f32 %v2314_v54, %v1091_v34  ;;  %v1167_v42 = vsub.f32 %v2316_v55, %v1091_v34  ;;  %v1365_v51 = vadd.f32 %v2547_v33, %v2545_v49 }
 0x327   : > { %1909 = vpow2.f32 %v1266_v20 }
 0x328   : > { %v2553_v52 = vpop.eup %1899  ;;  %v1268_v47 = vmul.f32 1.442695, %v1166_v7  ;;  %v1270_v9 = vmul.f32 1.442695, %v1167_v42  ;;  %1366 = vadd.xlane.f32.xlu0 %v1365_v51 }
 0x329   : > { %v2555_v18 = vpop.eup %1901  ;;  %v1094_v60 = vpop.xlane.xlu0 %1093 }
 0x32a   : > { %1911 = vpow2.f32 %v1268_v47  ;;  %v1168_v36 = vsub.f32 %v2320_v57, %v1094_v60  ;;  %v1169_v45 = vsub.f32 %v2322_v58, %v1094_v60  ;;  %v1368_v54 = vadd.f32 %v2555_v18, %v2553_v52 }
 0x32b   : > { %1913 = vpow2.f32 %v1270_v9 }
 0x32c   : > { %v2561_v55 = vpop.eup %1903  ;;  %v1272_v14 = vmul.f32 1.442695, %v1168_v36  ;;  %v1274_v12 = vmul.f32 1.442695, %v1169_v45  ;;  %1369 = vadd.xlane.f32.xlu1 %v1368_v54  ;;  %v2852_v54 = vld [vmem:[#allocation3_spill] sm:$0xff] }
 0x32d   : > { %v2563_v30 = vpop.eup %1905  ;;  %v1097_v38 = vpop.xlane.xlu0 %1096 }
 0x32e   : > { %1915 = vpow2.f32 %v1272_v14  ;;  %v1170_v39 = vsub.f32 %v2326_v62, %v1097_v38  ;;  %v1171_v48 = vsub.f32 %v2328_v2, %v1097_v38  ;;  %v1371_v57 = vadd.f32 %v2563_v30, %v2561_v55 }
 0x32f   : > { %1917 = vpow2.f32 %v1274_v12 }
 0x330   : > { %v2569_v58 = vpop.eup %1907  ;;  %v1276_v4 = vmul.f32 1.442695, %v1170_v39  ;;  %v1278_v20 = vmul.f32 1.442695, %v1171_v48  ;;  %1372 = vadd.xlane.f32.xlu0 %v1371_v57  ;;  %v2854_v57 = vld [vmem:[#allocation4_spill] sm:$0xff] }
 0x331   : > { %v2571_v34 = vpop.eup %1909  ;;  %v1100_v7 = vpop.xlane.xlu0 %1099 }
 0x332   : > { %1919 = vpow2.f32 %v1276_v4  ;;  %v1172_v42 = vsub.f32 %v2332_v8, %v1100_v7  ;;  %v1173_v51 = vsub.f32 %v2334_v11, %v1100_v7  ;;  %v1374_v62 = vadd.f32 %v2571_v34, %v2569_v58 }
 0x333   : > { %1921 = vpow2.f32 %v1278_v20  ;;  %v2855_v20 = vld [vmem:[#allocation5_spill] sm:$0xff] }
 0x334   : > { %v2577_v2 = vpop.eup %1911  ;;  %v1280_v47 = vmul.f32 1.442695, %v1172_v42  ;;  %v1282_v9 = vmul.f32 1.442695, %v1173_v51  ;;  %1375 = vadd.xlane.f32.xlu1 %v1374_v62 }
 0x335   : > { %v2579_v60 = vpop.eup %1913  ;;  %v1103_v36 = vpop.xlane.xlu0 %1102 }
 0x336   : > { %1923 = vpow2.f32 %v1280_v47  ;;  %v1174_v45 = vsub.f32 %v2338_v17, %v1103_v36  ;;  %v1175_v14 = vsub.f32 %v2852_v54, %v1103_v36  ;;  %v1377_v8 = vadd.f32 %v2579_v60, %v2577_v2  ;;  %v2857_v36 = vld [vmem:[#allocation6_spill] sm:$0xff]  ;;  %v2858_v54 = vld [vmem:[#allocation7_spill] sm:$0xff] }
 0x337   : > { %1925 = vpow2.f32 %v1282_v9 }
 0x338   : > { %v2585_v11 = vpop.eup %1915  ;;  %v1284_v12 = vmul.f32 1.442695, %v1174_v45  ;;  %v1286_v38 = vmul.f32 1.442695, %v1175_v14  ;;  %1378 = vadd.xlane.f32.xlu0 %v1377_v8 }
 0x339   : > { %2853 = vst [vmem:[#allocation3_spill] sm:$0xff] %v2585_v11  ;;  %v2587_v39 = vpop.eup %1917  ;;  %v1106_v48 = vpop.xlane.xlu0 %1105 }
 0x33a   : > { %1927 = vpow2.f32 %v1284_v12  ;;  %v1176_v4 = vsub.f32 %v2854_v57, %v1106_v48  ;;  %v1177_v7 = vsub.f32 %v2855_v20, %v1106_v48  ;;  %v1380_v17 = vadd.f32 %v2587_v39, %v2585_v11  ;;  %v2861_v20 = vld [vmem:[#allocation8_spill] sm:$0xff] }
 0x33b   : > { %1929 = vpow2.f32 %v1286_v38 }
 0x33c   : > { %v2593_v42 = vpop.eup %1919  ;;  %v1288_v51 = vmul.f32 1.442695, %v1176_v4  ;;  %v1290_v62 = vmul.f32 1.442695, %v1177_v7  ;;  %1381 = vadd.xlane.f32.xlu1 %v1380_v17  ;;  %v2862_v17 = vld [vmem:[#allocation9_spill] sm:$0xff] }
 0x33d   : > { %2856 = vst [vmem:[#allocation4_spill] sm:$0xff] %v2593_v42  ;;  %v2595_v47 = vpop.eup %1921  ;;  %v1109_v9 = vpop.xlane.xlu0 %1108 }
 0x33e   : > { %1931 = vpow2.f32 %v1288_v51  ;;  %v1178_v45 = vsub.f32 %v2857_v36, %v1109_v9  ;;  %v1179_v14 = vsub.f32 %v2858_v54, %v1109_v9  ;;  %v1383_v8 = vadd.f32 %v2595_v47, %v2593_v42 }
 0x33f   : > { %1933 = vpow2.f32 %v1290_v62 }
 0x340   : > { %v2601_v12 = vpop.eup %1923  ;;  %v1292_v38 = vmul.f32 1.442695, %v1178_v45  ;;  %v1294_v48 = vmul.f32 1.442695, %v1179_v14  ;;  %1384 = vadd.xlane.f32.xlu0 %v1383_v8  ;;  %v2863_v8 = vld [vmem:[#allocation10_spill] sm:$0xff] }
 0x341   : > { %2859 = vst [vmem:[#allocation5_spill] sm:$0xff] %v2601_v12  ;;  %v2603_v57 = vpop.eup %1925  ;;  %v1112_v4 = vpop.xlane.xlu0 %1111 }
 0x342   : > { %2860 = vst [vmem:[#allocation6_spill] sm:$0xff] %v2603_v57  ;;  %1935 = vpow2.f32 %v1292_v38  ;;  %v1180_v7 = vsub.f32 %v2861_v20, %v1112_v4  ;;  %v1181_v51 = vsub.f32 %v2862_v17, %v1112_v4  ;;  %v1386_v9 = vadd.f32 %v2603_v57, %v2601_v12  ;;  %v2864_v38 = vld [vmem:[#allocation11_spill] sm:$0xff] }
 0x343   : > { %1937 = vpow2.f32 %v1294_v48 }
 0x344   : > { %v2609_v36 = vpop.eup %1927  ;;  %v1296_v62 = vmul.f32 1.442695, %v1180_v7  ;;  %v1298_v54 = vmul.f32 1.442695, %v1181_v51  ;;  %1387 = vadd.xlane.f32.xlu1 %v1386_v9  ;;  %v2866_v9 = vld [vmem:[#allocation12_spill] sm:$0xff] }
 0x345   : > { %v2611_v45 = vpop.eup %1929  ;;  %v1115_v14 = vpop.xlane.xlu0 %1114 }
 0x346   : > { %1939 = vpow2.f32 %v1296_v62  ;;  %v1182_v11 = vsub.f32 %v2863_v8, %v1115_v14  ;;  %v1183_v42 = vsub.f32 %v2864_v38, %v1115_v14  ;;  %v1389_v4 = vadd.f32 %v2611_v45, %v2609_v36  ;;  %v2867_v62 = vld [vmem:[#allocation13_spill] sm:$0xff] }
 0x347   : > { %1941 = vpow2.f32 %v1298_v54 }
 0x348   : > { %v2617_v20 = vpop.eup %1931  ;;  %v1300_v48 = vmul.f32 1.442695, %v1182_v11  ;;  %v1302_v17 = vmul.f32 1.442695, %v1183_v42  ;;  %1390 = vadd.xlane.f32.xlu0 %v1389_v4 }
 0x349   : > { %2865 = vst [vmem:[#allocation7_spill] sm:$0xff] %v2617_v20  ;;  %v2619_v7 = vpop.eup %1933  ;;  %v1118_v51 = vpop.xlane.xlu1 %1117 }
 0x34a   : > { %1943 = vpow2.f32 %v1300_v48  ;;  %v1184_v12 = vsub.f32 %v2866_v9, %v1118_v51  ;;  %v1185_v57 = vsub.f32 %v2867_v62, %v1118_v51  ;;  %v1392_v14 = vadd.f32 %v2619_v7, %v2617_v20 }
 0x34b   : > { %1945 = vpow2.f32 %v1302_v17 }
 0x34c   : > { %v2625_v8 = vpop.eup %1935  ;;  %v1304_v54 = vmul.f32 1.442695, %v1184_v12  ;;  %v1306_v38 = vmul.f32 1.442695, %v1185_v57  ;;  %1393 = vadd.xlane.f32.xlu1 %v1392_v14 }
 0x34d   : > { %2868 = vst [vmem:[#allocation8_spill] sm:$0xff] %v2625_v8  ;;  %v2627_v11 = vpop.eup %1937 }
 0x34e   : > { %2869 = vst [vmem:[#allocation9_spill] sm:$0xff] %v2627_v11  ;;  %1947 = vpow2.f32 %v1304_v54  ;;  %v1395_v42 = vadd.f32 %v2627_v11, %v2625_v8  ;;  %v482_v54 = vld [vmem:[%s2805_s6] sm:$0xff] }
 0x34f   : > { %1949 = vpow2.f32 %v1306_v38 }
 0x350   : > { %v2631_v4 = vpop.eup %1939  ;;  %1396 = vadd.xlane.f32.xlu0 %v1395_v42  ;;  %v2876_v42 = vld [vmem:[#allocation14_spill] sm:$0xff] }
 0x351   : > { %2870 = vst [vmem:[#allocation10_spill] sm:$0xff] %v2631_v4  ;;  %v2633_v48 = vpop.eup %1941  ;;  %v1124_v38 = vpop.xlane.xlu1 %1123 }
 0x352   : > { %2871 = vst [vmem:[#allocation11_spill] sm:$0xff] %v2633_v48  ;;  %v1398_v17 = vadd.f32 %v2633_v48, %v2631_v4  ;;  %v2877_v48 = vld [vmem:[#allocation15_spill] sm:$0xff] }
 0x354   : > { %v2637_v51 = vpop.eup %1943  ;;  %1399 = vadd.xlane.f32.xlu1 %v1398_v17  ;;  %v1188_v17 = vsub.f32 %v2876_v42, %v1124_v38 }
 0x355   : > { %2872 = vst [vmem:[#allocation12_spill] sm:$0xff] %v2637_v51  ;;  %v2639_v12 = vpop.eup %1945 }
 0x356   : > { %2873 = vst [vmem:[#allocation13_spill] sm:$0xff] %v2639_v12  ;;  %v1401_v57 = vadd.f32 %v2639_v12, %v2637_v51  ;;  %v1189_v51 = vsub.f32 %v2877_v48, %v1124_v38  ;;  %v1312_v12 = vmul.f32 1.442695, %v1188_v17 }
 0x358   : > { %v2643_v9 = vpop.eup %1947  ;;  %1402 = vadd.xlane.f32.xlu0 %v1401_v57  ;;  %v1314_v20 = vmul.f32 1.442695, %v1189_v51 }
 0x359   : > { %2874 = vst [vmem:[#allocation16_spill] sm:$0xff] %v2643_v9  ;;  %v2645_v62 = vpop.eup %1949 }
 0x35a   : > { %2875 = vst [vmem:[#allocation17_spill] sm:$0xff] %v2645_v62  ;;  %v1404_v14 = vadd.f32 %v2645_v62, %v2643_v9 }
 0x35c   : > { %1405 = vadd.xlane.f32.xlu1 %v1404_v14 }
 0x364   : > { %v2654_v9 = vpop.f32.mrb[4].mxu0 }
 0x36d   : > { %488 = vperm.xlu1 %1834, %v482_v54   ;;  %v2656_v54 = vpop.f32.mrb[5].mxu0 }
 0x36e   : > { %2878 = vst [vmem:[#allocation14_spill] sm:$0xff] %v2656_v54 }
 0x379   : > { %v1322_v4 = vpop.xlane.xlu0 %1321 }
 0x37a   : > { %1951 = vrcp.f32 %v1322_v4 }
 0x37d   : > { %v1325_v57 = vpop.xlane.xlu0 %1324 }
 0x37e   : > { %1953 = vrcp.f32 %v1325_v57 }
 0x37f   : > { %1955 = vpow2.f32 %v1312_v12 }
 0x380   : > { %1957 = vpow2.f32 %v1314_v20 }
 0x381   : > { %v1328_v8 = vpop.xlane.xlu0 %1327 }
 0x382   : > { %1959 = vrcp.f32 %v1328_v8 }
 0x384   : > { %v1952_v62 = vpop.eup %1951 }
 0x385   : > { %v1331_v14 = vpop.xlane.xlu0 %1330  ;;  %v1449_v48 = vmul.f32 %v1952_v62, %v2421_v44  ;;  %v1448_v51 = vmul.f32 %v1952_v62, %v2419_v1 }
 0x386   : > { %1961 = vrcp.f32 %v1331_v14 }
 0x388   : > { %v1954_v42 = vpop.eup %1953 }
 0x389   : > { %v1334_v11 = vpop.xlane.xlu0 %1333  ;;  %v1451_v4 = vmul.f32 %v1954_v42, %v2429_v29  ;;  %v1450_v12 = vmul.f32 %v1954_v42, %v2427_v6  ;;  %v2662_v38 = vpop.eup %1955 }
 0x38a   : > { %v2664_v17 = vpop.eup %1957  ;;  %1963 = vrcp.f32 %v1334_v11 }
 0x38b   : > { %v1759_v20 = vpack.c.bf16 %v1451_v4, %v1449_v48  ;;  %v1761_v8 = vpack.c.bf16 %v1450_v12, %v1448_v51  ;;  %v1410_v44 = vadd.f32 %v2664_v17, %v2662_v38 }
 0x38c   : > { %v1960_v14 = vpop.eup %1959 }
 0x38d   : > { %1760 = vmatprep.subr.bf16.mxu1 %v1759_v20  ;;  %v1337_v57 = vpop.xlane.xlu0 %1336  ;;  %v1453_v1 = vmul.f32 %v1960_v14, %v2437_v61  ;;  %v1452_v62 = vmul.f32 %v1960_v14, %v2435_v10 }
 0x38e   : > { %1965 = vrcp.f32 %v1337_v57  ;;  %1762 = vmatpush1.bf16.xpose.msra.mxu1 %v1761_v8 }
 0x390   : > { %v1962_v29 = vpop.eup %1961 }
 0x391   : > { %v1121_v54 = vpop.xlane.xlu0 %1120  ;;  %1411 = vadd.xlane.f32.xlu1 %v1410_v44  ;;  %v1455_v6 = vmul.f32 %v1962_v29, %v2445_v32  ;;  %v1454_v42 = vmul.f32 %v1962_v29, %v2443_v13  ;;  %v1340_v4 = vpop.xlane.xlu1 %1339 }
 0x392   : > { %v1186_v11 = vsub.f32 %v2379_v41, %v1121_v54  ;;  %v1187_v48 = vsub.f32 %v2381_v50, %v1121_v54  ;;  %1967 = vrcp.f32 %v1340_v4 }
 0x393   : > { %v1763_v51 = vpack.c.bf16 %v1455_v6, %v1453_v1  ;;  %v1765_v12 = vpack.c.bf16 %v1454_v42, %v1452_v62 }
 0x394   : > { %v1308_v20 = vmul.f32 1.442695, %v1186_v11  ;;  %v1310_v8 = vmul.f32 1.442695, %v1187_v48  ;;  %v1964_v44 = vpop.eup %1963 }
 0x395   : > { %1764 = vmatprep.subr.bf16.mxu1 %v1763_v51  ;;  %v1343_v57 = vpop.xlane.xlu0 %1342  ;;  %v1457_v13 = vmul.f32 %v1964_v44, %v2453_v23  ;;  %v1456_v50 = vmul.f32 %v1964_v44, %v2451_v16  ;;  %v484_v16 = vld [vmem:[%s2805_s6 + $0x10] sm:$0xff]  ;;  %v485_v44 = vld [vmem:[%s2805_s6 + $0x18] sm:$0xff] }
 0x396   : > { %1969 = vpow2.f32 %v1308_v20  ;;  %1766 = vmatpush1.bf16.xpose.msra.mxu1 %v1765_v12 }
 0x397   : > { %1971 = vpow2.f32 %v1310_v8 }
 0x398   : > { %v1966_v61 = vpop.eup %1965  ;;  %1973 = vrcp.f32 %v1343_v57 }
 0x399   : > { %v1127_v10 = vpop.xlane.xlu0 %1126  ;;  %v1459_v41 = vmul.f32 %v1966_v61, %v2461_v0  ;;  %v1458_v32 = vmul.f32 %v1966_v61, %v2459_v19  ;;  %v1346_v29 = vpop.xlane.xlu1 %1345 }
 0x39a   : > { %v1190_v54 = vsub.f32 %v2391_v59, %v1127_v10  ;;  %v1191_v14 = vsub.f32 %v2393_v56, %v1127_v10  ;;  %1975 = vrcp.f32 %v1346_v29  ;;  %v2683_v19 = vpop.f32.mrb[6].mxu0 }
 0x39b   : > { %v1767_v1 = vpack.c.bf16 %v1459_v41, %v1457_v13  ;;  %v1769_v6 = vpack.c.bf16 %v1458_v32, %v1456_v50  ;;  %v2687_v56 = vpop.f32.mrb[7].mxu0 }
 0x39c   : > { %v1316_v62 = vmul.f32 1.442695, %v1190_v54  ;;  %v1318_v42 = vmul.f32 1.442695, %v1191_v14  ;;  %v1968_v23 = vpop.eup %1967  ;;  %v2691_v4 = vpop.f32.mrb[8].mxu0 }
 0x39d   : > { %1768 = vmatprep.subr.bf16.mxu1 %v1767_v1  ;;  %v1349_v11 = vpop.xlane.xlu0 %1348  ;;  %v2695_v20 = vpop.f32.mrb[9].mxu0  ;;  %v1461_v8 = vmul.f32 %v1968_v23, %v2469_v3  ;;  %v1460_v61 = vmul.f32 %v1968_v23, %v2467_v22 }
 0x39e   : > { %1977 = vpow2.f32 %v1316_v62  ;;  %1770 = vmatpush1.bf16.xpose.msra.mxu1 %v1769_v6  ;;  %v2704_v32 = vpop.f32.mrb[10].mxu0 }
 0x39f   : > { %1979 = vpow2.f32 %v1318_v42  ;;  %v2706_v3 = vpop.f32.mrb[11].mxu0 }
 0x3a0   : > { %v2685_v59 = vpop.eup %1969  ;;  %1981 = vrcp.f32 %v1349_v11 }
 0x3a1   : > { %v2689_v0 = vpop.eup %1971  ;;  %v1352_v48 = vpop.xlane.xlu1 %1351 }
 0x3a2   : > { %v1974_v51 = vpop.eup %1973  ;;  %498 = vperm.xlu1 %1834, %v484_v16   ;;  %v1407_v12 = vadd.f32 %v2689_v0, %v2685_v59  ;;  %1983 = vrcp.f32 %v1352_v48 }
 0x3a3   : > { %v1463_v57 = vmul.f32 %v1974_v51, %v2480_v53  ;;  %v1462_v10 = vmul.f32 %v1974_v51, %v2475_v25 }
 0x3a4   : > { %1408 = vadd.xlane.f32.xlu0 %v1407_v12  ;;  %v1976_v53 = vpop.eup %1975 }
 0x3a5   : > { %v1355_v13 = vpop.xlane.xlu0 %1354  ;;  %v1771_v41 = vpack.c.bf16 %v1463_v57, %v1461_v8  ;;  %v1773_v50 = vpack.c.bf16 %v1462_v10, %v1460_v61  ;;  %v1465_v1 = vmul.f32 %v1976_v53, %v2488_v63  ;;  %v1464_v62 = vmul.f32 %v1976_v53, %v2486_v5 }
 0x3a6   : > { %1985 = vrcp.f32 %v1355_v13  ;;  %503 = vperm.xlu1 %1834, %v485_v44  }
 0x3a7   : > { %1772 = vmatprep.subr.bf16.mxu1 %v1771_v41 }
 0x3a8   : > { %v2708_v54 = vpop.eup %1977  ;;  %1774 = vmatpush1.bf16.xpose.msra.mxu1 %v1773_v50 }
 0x3a9   : > { %v2710_v14 = vpop.eup %1979  ;;  %v1358_v22 = vpop.xlane.xlu1 %1357 }
 0x3aa   : > { %v1982_v25 = vpop.eup %1981  ;;  %v1413_v29 = vadd.f32 %v2710_v14, %v2708_v54  ;;  %1987 = vrcp.f32 %v1358_v22 }
 0x3ab   : > { %v1467_v6 = vmul.f32 %v1982_v25, %v2499_v15  ;;  %v1466_v42 = vmul.f32 %v1982_v25, %v2494_v31  ;;  %v483_v25 = vld [vmem:[%s2805_s6 + $0x8] sm:$0xff] }
 0x3ac   : > { %1414 = vadd.xlane.f32.xlu0 %v1413_v29  ;;  %v1984_v48 = vpop.eup %1983 }
 0x3ad   : > { %v1361_v11 = vpop.xlane.xlu0 %1360  ;;  %v1775_v23 = vpack.c.bf16 %v1467_v6, %v1465_v1  ;;  %v1777_v16 = vpack.c.bf16 %v1466_v42, %v1464_v62  ;;  %v1469_v8 = vmul.f32 %v1984_v48, %v2507_v27  ;;  %v1468_v5 = vmul.f32 %v1984_v48, %v2505_v26 }
 0x3ae   : > { %1989 = vrcp.f32 %v1361_v11 }
 0x3af   : > { %1776 = vmatprep.subr.bf16.mxu1 %v1775_v23 }
 0x3b0   : > { %v1986_v51 = vpop.eup %1985  ;;  %1778 = vmatpush1.bf16.xpose.msra.mxu1 %v1777_v16 }
 0x3b1   : > { %v1364_v12 = vpop.xlane.xlu1 %1363  ;;  %v1471_v63 = vmul.f32 %v1986_v51, %v2515_v21  ;;  %v1470_v15 = vmul.f32 %v1986_v51, %v2513_v37 }
 0x3b2   : > { %1991 = vrcp.f32 %v1364_v12 }
 0x3b3   : > { %v1779_v31 = vpack.c.bf16 %v1471_v63, %v1469_v8  ;;  %v1781_v57 = vpack.c.bf16 %v1470_v15, %v1468_v5 }
 0x3b4   : > { %v1988_v61 = vpop.eup %1987 }
 0x3b5   : > { %v1367_v44 = vpop.xlane.xlu0 %1366  ;;  %1780 = vmatprep.subr.bf16.mxu1 %v1779_v31  ;;  %v1473_v41 = vmul.f32 %v1988_v61, %v2523_v24  ;;  %v1472_v37 = vmul.f32 %v1988_v61, %v2521_v40 }
 0x3b6   : > { %1993 = vrcp.f32 %v1367_v44 }
 0x3b8   : > { %v1990_v10 = vpop.eup %1989  ;;  %1782 = vmatpush1.bf16.xpose.msra.mxu1 %v1781_v57 }
 0x3b9   : > { %v1370_v13 = vpop.xlane.xlu1 %1369  ;;  %v1475_v27 = vmul.f32 %v1990_v10, %v2531_v28  ;;  %v1474_v21 = vmul.f32 %v1990_v10, %v2529_v43 }
 0x3ba   : > { %1995 = vrcp.f32 %v1370_v13 }
 0x3bb   : > { %v1783_v50 = vpack.c.bf16 %v1475_v27, %v1473_v41  ;;  %v1785_v26 = vpack.c.bf16 %v1474_v21, %v1472_v37  ;;  %v2879_v41 = vld [vmem:[#allocation4_spill] sm:$0xff]  ;;  %v2880_v27 = vld [vmem:[#allocation3_spill] sm:$0xff] }
 0x3bc   : > { %v1992_v22 = vpop.eup %1991 }
 0x3bd   : > { %v1373_v53 = vpop.xlane.xlu0 %1372  ;;  %1784 = vmatprep.subr.bf16.mxu1 %v1783_v50  ;;  %v1477_v28 = vmul.f32 %v1992_v22, %v2539_v35  ;;  %v1476_v1 = vmul.f32 %v1992_v22, %v2537_v46  ;;  %v2881_v22 = vld [vmem:[#allocation6_spill] sm:$0xff] }
 0x3be   : > { %1997 = vrcp.f32 %v1373_v53 }
 0x3c0   : > { %v1994_v29 = vpop.eup %1993  ;;  %1786 = vmatpush1.bf16.xpose.msra.mxu1 %v1785_v26 }
 0x3c1   : > { %v1376_v24 = vpop.xlane.xlu1 %1375  ;;  %v1479_v43 = vmul.f32 %v1994_v29, %v2547_v33  ;;  %v1478_v40 = vmul.f32 %v1994_v29, %v2545_v49  ;;  %v2882_v29 = vld [vmem:[#allocation5_spill] sm:$0xff] }
 0x3c2   : > { %493 = vperm.xlu0 %1833, %v483_v25   ;;  %1999 = vrcp.f32 %v1376_v24 }
 0x3c3   : > { %v1787_v6 = vpack.c.bf16 %v1479_v43, %v1477_v28  ;;  %v1789_v62 = vpack.c.bf16 %v1478_v40, %v1476_v1 }
 0x3c4   : > { %v1996_v11 = vpop.eup %1995 }
 0x3c5   : > { %v1379_v42 = vpop.xlane.xlu0 %1378  ;;  %1788 = vmatprep.subr.bf16.mxu1 %v1787_v6  ;;  %v1481_v48 = vmul.f32 %v1996_v11, %v2555_v18  ;;  %v1480_v49 = vmul.f32 %v1996_v11, %v2553_v52  ;;  %v2883_v11 = vld [vmem:[#allocation9_spill] sm:$0xff] }
 0x3c6   : > { %2001 = vrcp.f32 %v1379_v42 }
 0x3c8   : > { %v1998_v23 = vpop.eup %1997  ;;  %1790 = vmatpush1.bf16.xpose.msra.mxu1 %v1789_v62 }
 0x3c9   : > { %v1382_v16 = vpop.xlane.xlu1 %1381  ;;  %v1483_v35 = vmul.f32 %v1998_v23, %v2563_v30  ;;  %v1482_v33 = vmul.f32 %v1998_v23, %v2561_v55 }
 0x3ca   : > { %2003 = vrcp.f32 %v1382_v16  ;;  %v2884_v16 = vld [vmem:[#allocation8_spill] sm:$0xff] }
 0x3cb   : > { %v1791_v51 = vpack.c.bf16 %v1483_v35, %v1481_v48  ;;  %v1793_v46 = vpack.c.bf16 %v1482_v33, %v1480_v49  ;;  %v2885_v48 = vld [vmem:[#allocation7_spill] sm:$0xff] }
 0x3cc   : > { %v2000_v8 = vpop.eup %1999 }
 0x3cd   : > { %v1385_v12 = vpop.xlane.xlu0 %1384  ;;  %1792 = vmatprep.subr.bf16.mxu1 %v1791_v51  ;;  %v1485_v5 = vmul.f32 %v2000_v8, %v2571_v34  ;;  %v1484_v55 = vmul.f32 %v2000_v8, %v2569_v58 }
 0x3ce   : > { %2005 = vrcp.f32 %v1385_v12  ;;  %v2886_v12 = vld [vmem:[#allocation14_spill] sm:$0xff] }
 0x3d0   : > { %v2002_v63 = vpop.eup %2001  ;;  %1794 = vmatpush1.bf16.xpose.msra.mxu1 %v1793_v46 }
 0x3d1   : > { %v1388_v15 = vpop.xlane.xlu1 %1387  ;;  %v1487_v18 = vmul.f32 %v2002_v63, %v2579_v60  ;;  %v1486_v30 = vmul.f32 %v2002_v63, %v2577_v2 }
 0x3d2   : > { %2007 = vrcp.f32 %v1388_v15  ;;  %v2887_v15 = vld [vmem:[#allocation11_spill] sm:$0xff] }
 0x3d3   : > { %v1795_v31 = vpack.c.bf16 %v1487_v18, %v1485_v5  ;;  %v1797_v52 = vpack.c.bf16 %v1486_v30, %v1484_v55  ;;  %v2888_v5 = vld [vmem:[#allocation13_spill] sm:$0xff]  ;;  %v2889_v30 = vld [vmem:[#allocation12_spill] sm:$0xff] }
 0x3d4   : > { %v2004_v44 = vpop.eup %2003 }
 0x3d5   : > { %v1391_v57 = vpop.xlane.xlu0 %1390  ;;  %1796 = vmatprep.subr.bf16.mxu1 %v1795_v31  ;;  %v1489_v13 = vmul.f32 %v2004_v44, %v2587_v39  ;;  %v1488_v2 = vmul.f32 %v2004_v44, %v2880_v27  ;;  %v2890_v31 = vld [vmem:[#allocation10_spill] sm:$0xff] }
 0x3d6   : > { %2009 = vrcp.f32 %v1391_v57 }
 0x3d8   : > { %v2006_v61 = vpop.eup %2005  ;;  %1798 = vmatpush1.bf16.xpose.msra.mxu1 %v1797_v52 }
 0x3d9   : > { %v1394_v10 = vpop.xlane.xlu1 %1393  ;;  %v1491_v34 = vmul.f32 %v2006_v61, %v2595_v47  ;;  %v1490_v60 = vmul.f32 %v2006_v61, %v2879_v41  ;;  %v2891_v41 = vld [vmem:[#allocation17_spill] sm:$0xff] }
 0x3da   : > { %2011 = vrcp.f32 %v1394_v10 }
 0x3db   : > { %v1799_v21 = vpack.c.bf16 %v1491_v34, %v1489_v13  ;;  %v1801_v58 = vpack.c.bf16 %v1490_v60, %v1488_v2  ;;  %v2892_v2 = vld [vmem:[#allocation16_spill] sm:$0xff] }
 0x3dc   : > { %v2008_v50 = vpop.eup %2007 }
 0x3dd   : > { %v1397_v37 = vpop.xlane.xlu0 %1396  ;;  %1800 = vmatprep.subr.bf16.mxu1 %v1799_v21  ;;  %v1493_v25 = vmul.f32 %v2008_v50, %v2881_v22  ;;  %v1492_v24 = vmul.f32 %v2008_v50, %v2882_v29 }
 0x3de   : > { %2013 = vrcp.f32 %v1397_v37 }
 0x3e0   : > { %v2010_v26 = vpop.eup %2009  ;;  %1802 = vmatpush1.bf16.xpose.msra.mxu1 %v1801_v58 }
 0x3e1   : > { %v1400_v53 = vpop.xlane.xlu1 %1399  ;;  %v1495_v39 = vmul.f32 %v2010_v26, %v2611_v45  ;;  %v1494_v47 = vmul.f32 %v2010_v26, %v2609_v36 }
 0x3e2   : > { %2015 = vrcp.f32 %v1400_v53 }
 0x3e3   : > { %v1803_v28 = vpack.c.bf16 %v1495_v39, %v1493_v25  ;;  %v1805_v43 = vpack.c.bf16 %v1494_v47, %v1492_v24 }
 0x3e4   : > { %v2012_v1 = vpop.eup %2011 }
 0x3e5   : > { %v1403_v40 = vpop.xlane.xlu0 %1402  ;;  %1804 = vmatprep.subr.bf16.mxu1 %v1803_v28  ;;  %v1497_v42 = vmul.f32 %v2012_v1, %v2619_v7  ;;  %v1496_v36 = vmul.f32 %v2012_v1, %v2885_v48 }
 0x3e6   : > { %2017 = vrcp.f32 %v1403_v40  ;;  %v1602_v40 = vstv %s1601_s17 }
 0x3e8   : > { %v2014_v6 = vpop.eup %2013  ;;  %1806 = vmatpush1.bf16.xpose.msra.mxu1 %v1805_v43 }
 0x3e9   : > { %v1406_v62 = vpop.xlane.xlu1 %1405  ;;  %v1499_v23 = vmul.f32 %v2014_v6, %v2883_v11  ;;  %v1498_v45 = vmul.f32 %v2014_v6, %v2884_v16  ;;  %v2028_v6 = vld [vmem:[%s2117_s15 + $0x8] sm:$0xff] }
 0x3ea   : > { %2019 = vrcp.f32 %v1406_v62 }
 0x3eb   : > { %v1807_v35 = vpack.c.bf16 %v1499_v23, %v1497_v42  ;;  %v1809_v33 = vpack.c.bf16 %v1498_v45, %v1496_v36  ;;  %v2029_v45 = vld [vmem:[%s2117_s15 + $0x10] sm:$0xff]  ;;  %v2030_v36 = vld [vmem:[%s2117_s15 + $0x18] sm:$0xff] }
 0x3ec   : > { %v2016_v51 = vpop.eup %2015 }
 0x3ed   : > { %1808 = vmatprep.subr.bf16.mxu1 %v1807_v35  ;;  %v489_v49 = vpop.permute.xlu1 %488  ;;  %v1501_v7 = vmul.f32 %v2016_v51, %v2887_v15  ;;  %v1500_v52 = vmul.f32 %v2016_v51, %v2890_v31 }
 0x3ee   : > { %v585_v46 = vadd.f32 %v2654_v9, %v489_v49  ;;  %v587_v8 = vadd.f32 %v2886_v12, %v489_v49  ;;  %v2031_v12 = vld [vmem:[%s2117_s15 + $0x20] sm:$0xff] }
 0x3f0   : > { %v2018_v63 = vpop.eup %2017  ;;  %1810 = vmatpush1.bf16.xpose.msra.mxu1 %v1809_v33  ;;  %1576 = vmatprep.mubr.f32.mxu1 %v587_v8 }
 0x3f1   : > { %v1503_v18 = vmul.f32 %v2018_v63, %v2888_v5  ;;  %v1502_v55 = vmul.f32 %v2018_v63, %v2889_v30  ;;  %v2032_v63 = vld [vmem:[%s2117_s15 + $0x28] sm:$0xff] }
 0x3f3   : > { %v1811_v57 = vpack.c.bf16 %v1503_v18, %v1501_v7  ;;  %v1813_v44 = vpack.c.bf16 %v1502_v55, %v1500_v52  ;;  %v2033_v55 = vld [vmem:[%s2117_s15 + $0x30] sm:$0xff]  ;;  %v2034_v52 = vld [vmem:[%s2117_s15 + $0x38] sm:$0xff] }
 0x3f4   : > { %v2020_v13 = vpop.eup %2019 }
 0x3f5   : > { %1812 = vmatprep.subr.bf16.mxu1 %v1811_v57  ;;  %v1505_v60 = vmul.f32 %v2020_v13, %v2891_v41  ;;  %v1504_v21 = vmul.f32 %v2020_v13, %v2892_v2 }
 0x3f8   : > { %1814 = vmatpush1.bf16.xpose.msra.mxu1 %v1813_v44 }
 0x41e   : > { %v1412_v9 = vpop.xlane.xlu1 %1411 }
 0x431   : > { %v1409_v61 = vpop.xlane.xlu0 %1408 }
 0x432   : > { %2021 = vrcp.f32 %v1409_v61 }
 0x433   : > { %2023 = vrcp.f32 %v1412_v9 }
 0x439   : > { %v1415_v10 = vpop.xlane.xlu0 %1414 }
 0x43a   : > { %2025 = vrcp.f32 %v1415_v10 }
 0x43c   : > { %v2022_v34 = vpop.eup %2021 }
 0x43d   : > { %v1507_v27 = vmul.f32 %v2022_v34, %v2689_v0  ;;  %v1506_v58 = vmul.f32 %v2022_v34, %v2685_v59  ;;  %v2024_v26 = vpop.eup %2023  ;;  %v499_v59 = vpop.permute.xlu1 %498 }
 0x43e   : > { %v1509_v22 = vmul.f32 %v2024_v26, %v2664_v17  ;;  %v1508_v39 = vmul.f32 %v2024_v26, %v2662_v38  ;;  %v599_v17 = vadd.f32 %v2695_v20, %v499_v59  ;;  %v597_v38 = vadd.f32 %v2691_v4, %v499_v59 }
 0x43f   : > { %v1815_v37 = vpack.c.bf16 %v1507_v27, %v1505_v60  ;;  %v1817_v50 = vpack.c.bf16 %v1506_v58, %v1504_v21 }
 0x441   : > { %1816 = vmatprep.subr.bf16.mxu1 %v1815_v37  ;;  %v494_v24 = vpop.permute.xlu0 %493 }
 0x442   : > { %1818 = vmatpush1.bf16.xpose.msra.mxu1 %v1817_v50  ;;  %v593_v28 = vadd.f32 %v2687_v56, %v494_v24  ;;  %v591_v43 = vadd.f32 %v2683_v19, %v494_v24 }
 0x444   : > { %v2026_v53 = vpop.eup %2025 }
 0x445   : > { %v1511_v25 = vmul.f32 %v2026_v53, %v2710_v14  ;;  %v1510_v47 = vmul.f32 %v2026_v53, %v2708_v54  ;;  %v504_v14 = vpop.permute.xlu1 %503 }
 0x446   : > { %v605_v54 = vadd.f32 %v2706_v3, %v504_v14  ;;  %v603_v56 = vadd.f32 %v2704_v32, %v504_v14  ;;  %v2027_v3 = vld [vmem:[%s2117_s15] sm:$0xff] }
 0x447   : > { %v1819_v29 = vpack.c.bf16 %v1511_v25, %v1509_v22  ;;  %v1821_v0 = vpack.c.bf16 %v1510_v47, %v1508_v39 }
 0x449   : > { %1820 = vmatprep.subr.bf16.mxu1 %v1819_v29 }
 0x44a   : > { %1822 = vmatpush1.bf16.xpose.msra.mxu1 %v1821_v0 }
 0x451   : > { %1577 = vmatmul.mubr.f32.vlgmr.msra.gmra.mrb[64].mxu1 %v585_v46 }
 0x452   : > { %1582 = vmatprep.mubr.f32.mxu1 %v593_v28 }
 0x455   : > { %1583 = vmatmul.mubr.f32.gmra.mrb[66].mxu1 %v591_v43 }
 0x456   : > { %1588 = vmatprep.mubr.f32.mxu1 %v599_v17 }
 0x459   : > { %1589 = vmatmul.mubr.f32.gmra.mrb[68].mxu1 %v597_v38 }
 0x45a   : > { %1594 = vmatprep.mubr.f32.mxu1 %v605_v54 }
 0x45d   : > { %1595 = vmatmul.mubr.f32.gmra.mrb[70].mxu1 %v603_v56 }
 0x524   : > { %v1578_v19 = vpop.f32.mrb[64].mxu1 }
 0x525   : > { %v1603_v1 = vmul.f32 %v1602_v40, %v1578_v19  ;;  %v1580_v20 = vpop.f32.mrb[65].mxu1 }
 0x526   : > { %v1604_v4 = vmul.f32 %v1602_v40, %v1580_v20 }
 0x527   : > { %v1611_v32 = vadd.f32 %v2027_v3, %v1603_v1 }
 0x528   : > { %v1612_v62 = vadd.f32 %v2028_v6, %v1604_v4  ;;  %v1584_v42 = vpop.f32.mrb[66].mxu1 }
 0x529   : > { %1619 = vst [vmem:[%s2778_s20] sm:$0xff] %v1611_v32  ;;  %v1605_v11 = vmul.f32 %v1602_v40, %v1584_v42  ;;  %v1586_v23 = vpop.f32.mrb[67].mxu1 }
 0x52a   : > { %1620 = vst [vmem:[%s2778_s20 + $0x8] sm:$0xff] %v1612_v62  ;;  %v1606_v16 = vmul.f32 %v1602_v40, %v1586_v23 }
 0x52b   : > { %v1613_v48 = vadd.f32 %v2029_v45, %v1605_v11 }
 0x52c   : > { %v1614_v35 = vadd.f32 %v2030_v36, %v1606_v16  ;;  %v1590_v33 = vpop.f32.mrb[68].mxu1 }
 0x52d   : > { %1621 = vst [vmem:[%s2778_s20 + $0x10] sm:$0xff] %v1613_v48  ;;  %v1607_v49 = vmul.f32 %v1602_v40, %v1590_v33  ;;  %v1592_v51 = vpop.f32.mrb[69].mxu1 }
 0x52e   : > { %1622 = vst [vmem:[%s2778_s20 + $0x18] sm:$0xff] %v1614_v35  ;;  %v1608_v46 = vmul.f32 %v1602_v40, %v1592_v51 }
 0x52f   : > { %v1615_v8 = vadd.f32 %v2031_v12, %v1607_v49 }
 0x530   : > { %v1616_v15 = vadd.f32 %v2032_v63, %v1608_v46  ;;  %v1596_v7 = vpop.f32.mrb[70].mxu1 }
 0x531   : > { %1623 = vst [vmem:[%s2778_s20 + $0x20] sm:$0xff] %v1615_v8  ;;  %v1609_v5 = vmul.f32 %v1602_v40, %v1596_v7  ;;  %v1598_v18 = vpop.f32.mrb[71].mxu1 }
 0x532   : > { %1624 = vst [vmem:[%s2778_s20 + $0x28] sm:$0xff] %v1616_v15  ;;  %v1610_v30 = vmul.f32 %v1602_v40, %v1598_v18 }
 0x533   : > { %v1617_v31 = vadd.f32 %v2033_v55, %v1609_v5 }
 0x534   : > { %v1618_v57 = vadd.f32 %v2034_v52, %v1610_v30 }
 0x535   : > { %1625 = vst [vmem:[%s2778_s20 + $0x30] sm:$0xff] %v1617_v31 }
 0x536   : > { %1626 = vst [vmem:[%s2778_s20 + $0x38] sm:$0xff] %v1618_v57 }
 0x537 PF: > { %s19_s29 = sadd.s32 1, %s2041_s29  }
 0x538   : > { %p16_p4 = scmp.ge.s32.totalorder %s19_s29, 4  }
 0x53a   :  { %18 = sbr.rel (!%p16_p4) target bundleno = 2 (0x2), region = 82 }

</bundles_post_ra>
